<compile_context>
chip_gen: v6e
topology: v6e:2x2x1
jax: 0.10.0
libtpu: 0.0.40
codegen_flags: <defaults>
</compile_context>

<pallas_src>
import math
import re
import functools

import jax
import jax.numpy as jnp
from jax.experimental import pallas as pl
from jax.experimental.pallas import tpu as pltpu


# ----------------------------------------------------------------------------
# Generation / VMEM detection (done once at import; all fallbacks are safe).
# ----------------------------------------------------------------------------
def _tpu_generation():
    try:
        kind = jax.devices()[0].device_kind  # e.g. "TPU v5e", "TPU v6e", "TPU7x"
    except Exception:
        return 6
    m = re.search(r"(\d+)", kind)
    return int(m.group(1)) if m else 6


def _detect_vmem_limit(gen):
    cap = None
    try:
        cap = int(pltpu.get_tpu_info().vmem_capacity_bytes)
    except Exception:
        cap = None
    if not cap:
        cap = (64 if gen >= 7 else 128) * 1024 * 1024
    # Leave ~25% headroom for compiler-internal scratch and extra double buffers.
    return max(32 * 1024 * 1024, (cap * 3) // 4)


_GEN = _tpu_generation()
_USE_BF16_EXP = _GEN >= 6          # v6e/v7x have a bf16 EUP; v5e and older do not.
_VMEM_LIMIT = _detect_vmem_limit(_GEN)
_ROW_TILE_TARGET = 512             # qkv / out-proj row tiles (divisor-clamped per shape)


def _attn_tile_defaults():
    # v7x: only 64 MiB VMEM and 2 TCs -> smaller tiles, more parallel grid steps.
    if _GEN >= 7:
        return 8, 256, 512
    # v5e/v6e: 128 MiB VMEM -> bigger tq (divides K/V HBM re-streaming) and tk.
    return 8, 512, 1024


def _head_tile(bh, target):
    """Largest divisor of bh that is <= target."""
    t = max(1, min(target, bh))
    while bh % t:
        t -= 1
    return t


def _seq_tile(l, target):
    """Largest divisor of l <= target that is a multiple of 8 (or l itself)."""
    for t in range(min(target, l), 0, -1):
        if l % t == 0 and (t % 8 == 0 or t == l):
            return t
    return l


def _row_tile(n, target):
    if _GEN >= 7:                          # keep >=2 row tiles for the 2 TensorCores
        target = min(target, max(8, n // 2))
    return _seq_tile(n, target)


# ----------------------------------------------------------------------------
# Kernel 1: fused Q/K/V projection.
#   x: [N, D] bf16, w: [3, D, D] bf16 (pre-transposed; Q plane pre-scaled by 1/sqrt(dh)),
#   b: [3, 1, D] f32, out: [3, N, D] bf16.
#   grid = (3, row tiles): the weight plane is the outer axis, so each [D, D] plane is
#   DMA'd from HBM exactly once (x is re-streamed 3x, which is cheaper whenever D > tm).
# ----------------------------------------------------------------------------
def _qkv_kernel(x_ref, w_ref, b_ref, o_ref):
    acc = jnp.dot(x_ref[...], w_ref[0], preferred_element_type=jnp.float32)
    o_ref[0] = (acc + b_ref[0]).astype(o_ref.dtype)


def qkv_projection(x_bf16, w_qkv_bf16, b_qkv_f32, *, tm_target=None):
    n, din = x_bf16.shape
    dout = w_qkv_bf16.shape[2]
    tm = _row_tile(n, tm_target or _ROW_TILE_TARGET)
    grid = (3, n // tm)
    # TODO(synk): at very large D the double-buffered [D,D] weight plane itself gets big;
    # tiling dout with a third grid axis would bound it (not needed at these sizes).
    return pl.pallas_call(
        _qkv_kernel,
        out_shape=jax.ShapeDtypeStruct((3, n, dout), jnp.bfloat16),
        grid=grid,
        in_specs=[
            pl.BlockSpec((tm, din), lambda j, i: (i, 0)),
            pl.BlockSpec((1, din, dout), lambda j, i: (j, 0, 0)),   # resident across i
            pl.BlockSpec((1, 1, dout), lambda j, i: (j, 0, 0)),
        ],
        out_specs=pl.BlockSpec((1, tm, dout), lambda j, i: (j, i, 0)),
        compiler_params=pltpu.CompilerParams(
            dimension_semantics=("parallel", "parallel"),
            vmem_limit_bytes=_VMEM_LIMIT),
    )(x_bf16, w_qkv_bf16, b_qkv_f32)


# ----------------------------------------------------------------------------
# Kernel 2: flash-style scaled dot-product attention.
#   grid = (head blocks, q tiles, kv tiles); kv axis last, "arbitrary".
#   Online softmax with f32 scratch m/l/acc; bf16 MXU matmuls, f32 accumulation.
#   The 1/sqrt(dh) scale is already folded into q (via wq/bq) by the wrapper.
# ----------------------------------------------------------------------------
def _flash_mha_kernel(use_bf16_exp, q_ref, k_ref, v_ref, o_ref, m_sc, l_sc, acc_sc):
    kv = pl.program_id(2)

    @pl.when(kv == 0)
    def _():
        m_sc[...] = jnp.full(m_sc.shape, -jnp.inf, jnp.float32)
        l_sc[...] = jnp.zeros(l_sc.shape, jnp.float32)
        acc_sc[...] = jnp.zeros(acc_sc.shape, jnp.float32)

    s = jnp.einsum("hqd,hkd->hqk", q_ref[...], k_ref[...],
                   preferred_element_type=jnp.float32)            # [hb, tq, tk] f32

    m_prev = m_sc[...]
    m_new = jnp.maximum(m_prev, s.max(axis=-1, keepdims=True))
    alpha = jnp.exp(m_prev - m_new)                               # f32 (small)
    if use_bf16_exp:
        # v6e/v7x: bf16 EUP -> roughly halves the (EUP-bound) exp cost; also removes the
        # explicit f32->bf16 pack of p before the PV matmul.
        p = jnp.exp((s - m_new).astype(jnp.bfloat16))             # bf16
        p_sum = jnp.sum(p.astype(jnp.float32), axis=-1, keepdims=True)
    else:
        # v5e: no bf16 EUP -> keep exp in f32, pack afterwards.
        p_f32 = jnp.exp(s - m_new)
        p_sum = jnp.sum(p_f32, axis=-1, keepdims=True)
        p = p_f32.astype(jnp.bfloat16)

    l_sc[...] = alpha * l_sc[...] + p_sum
    acc_sc[...] = alpha * acc_sc[...] + jnp.einsum(
        "hqk,hkd->hqd", p, v_ref[...], preferred_element_type=jnp.float32)
    m_sc[...] = m_new

    @pl.when(kv == pl.num_programs(2) - 1)
    def _():
        inv_l = pl.reciprocal(l_sc[...], approx=True)             # EUP slot
        # NOTE(perf): for dh < 128 this store is lane-masked; a lane-dense [bh, L*dh]
        # output slab would be denser but needs a bundle-verified in-kernel relayout,
        # so it is intentionally not done here.
        o_ref[...] = (acc_sc[...] * inv_l).astype(o_ref.dtype)


def scaled_dot_product_attention(q, k, v, *, hb_target=None, tq_target=None,
                                 tk_target=None):
    bh, l, dh = q.shape
    d_hb, d_tq, d_tk = _attn_tile_defaults()
    hb_t = hb_target or d_hb
    tq_t = tq_target or d_tq
    tk_t = tk_target or d_tk
    if _GEN >= 7:
        hb_t = min(hb_t, max(1, bh // 2))   # keep >=2 parallel head blocks for 2 TCs
    hb = _head_tile(bh, hb_t)
    tq = _seq_tile(l, tq_t)
    tk = _seq_tile(l, tk_t)
    grid = (bh // hb, l // tq, l // tk)
    kernel = functools.partial(_flash_mha_kernel, _USE_BF16_EXP)
    return pl.pallas_call(
        kernel,
        out_shape=jax.ShapeDtypeStruct((bh, l, dh), jnp.bfloat16),
        grid=grid,
        in_specs=[
            pl.BlockSpec((hb, tq, dh), lambda h, qi, ki: (h, qi, 0)),
            pl.BlockSpec((hb, tk, dh), lambda h, qi, ki: (h, ki, 0)),
            pl.BlockSpec((hb, tk, dh), lambda h, qi, ki: (h, ki, 0)),
        ],
        out_specs=pl.BlockSpec((hb, tq, dh), lambda h, qi, ki: (h, qi, 0)),
        scratch_shapes=[
            pltpu.VMEM((hb, tq, 1), jnp.float32),     # running max m
            pltpu.VMEM((hb, tq, 1), jnp.float32),     # running sum l
            pltpu.VMEM((hb, tq, dh), jnp.float32),    # accumulator
        ],
        compiler_params=pltpu.CompilerParams(
            dimension_semantics=("parallel", "parallel", "arbitrary"),
            vmem_limit_bytes=_VMEM_LIMIT),
    )(q, k, v)


# ----------------------------------------------------------------------------
# Kernel 3: output projection + residual + LayerNorm (fused), row-tiled.
#   ctx: [N, D] bf16, w: [D, D] bf16 (pre-transposed), residual x / LN params f32.
# ----------------------------------------------------------------------------
def _out_ln_kernel(ctx_ref, w_ref, b_ref, x_ref, gamma_ref, beta_ref, o_ref):
    y = jnp.dot(ctx_ref[...], w_ref[...], preferred_element_type=jnp.float32)
    y = y + b_ref[...] + x_ref[...]                       # bias + residual (f32)
    mean = jnp.mean(y, axis=-1, keepdims=True)
    var = jnp.mean(jnp.square(y - mean), axis=-1, keepdims=True)
    y_hat = (y - mean) * jax.lax.rsqrt(var + 1e-5)        # torch LayerNorm eps
    o_ref[...] = (y_hat * gamma_ref[...] + beta_ref[...]).astype(o_ref.dtype)


def out_proj_layernorm(ctx_bf16, w_t_bf16, b, x_res, gamma, beta, *, tm_target=None):
    n, d = x_res.shape
    tm = _row_tile(n, tm_target or _ROW_TILE_TARGET)
    grid = (n // tm,)

    # The weight block is grid-invariant; BlockSpec still double-buffers it. At large D
    # that alone can exceed v7x's 64 MiB VMEM, so single-buffer it past a size threshold.
    w_bytes_2buf = 2 * 2 * d * d                       # 2 buffers x bf16[D,D]
    if w_bytes_2buf > _VMEM_LIMIT // 3:
        w_spec = pl.BlockSpec((d, d), lambda i: (0, 0), pipeline_mode=pl.Buffered(1))
    else:
        w_spec = pl.BlockSpec((d, d), lambda i: (0, 0))

    return pl.pallas_call(
        _out_ln_kernel,
        out_shape=jax.ShapeDtypeStruct((n, d), jnp.float32),
        grid=grid,
        in_specs=[
            pl.BlockSpec((tm, d), lambda i: (i, 0)),
            w_spec,                                      # weight resident
            pl.BlockSpec((1, d), lambda i: (0, 0)),
            pl.BlockSpec((tm, d), lambda i: (i, 0)),
            pl.BlockSpec((1, d), lambda i: (0, 0)),
            pl.BlockSpec((1, d), lambda i: (0, 0)),
        ],
        out_specs=pl.BlockSpec((tm, d), lambda i: (i, 0)),
        compiler_params=pltpu.CompilerParams(
            dimension_semantics=("parallel",),
            vmem_limit_bytes=_VMEM_LIMIT),
    )(ctx_bf16, w_t_bf16, b.reshape(1, d), x_res,
      gamma.reshape(1, d), beta.reshape(1, d))


# ----------------------------------------------------------------------------
# Module-level forward
# ----------------------------------------------------------------------------
@functools.partial(jax.jit, static_argnames=("num_head", "tiles"))
def multi_head_attention(x, params, num_head, tiles=None):
    """tiles: optional (hb, tq, tk, tm) tile-target override (used to exercise
    the multi-tile / multi-kv-step paths in testing)."""
    b, l, d = x.shape
    dh = d // num_head
    scale = dh ** (-0.5)
    xf = x.reshape(b * l, d)
    xf_bf16 = xf.astype(jnp.bfloat16)

    # One-time dtype/layout prep (XLA, outside kernels): bf16 activations, pre-transposed
    # & stacked weights so kernels never transpose in VMEM. The 1/sqrt(dh) attention scale
    # is folded into the Q projection here, once, in f32.
    w_qkv = jnp.stack([params["wq"].T * scale, params["wk"].T, params["wv"].T]
                      ).astype(jnp.bfloat16)                                   # [3, D, D]
    b_qkv = jnp.stack([params["bq"] * scale, params["bk"], params["bv"]])[:, None, :]
    w_o_t = params["wo"].T.astype(jnp.bfloat16)                                # [D, D]

    if tiles is None:
        hb_t = tq_t = tk_t = tm_t = None
    else:
        hb_t, tq_t, tk_t, tm_t = tiles

    qkv = qkv_projection(xf_bf16, w_qkv, b_qkv, tm_target=tm_t)    # [3, B*L, D] bf16

    # Exact replica of torch: Q.view(batch_size * num_head, -1, dim_head)
    # (contiguous flat split, NOT a transpose split) -- free reshape.
    qh = qkv[0].reshape(b * num_head, -1, dh)
    kh = qkv[1].reshape(b * num_head, -1, dh)
    vh = qkv[2].reshape(b * num_head, -1, dh)

    ctx = scaled_dot_product_attention(qh, kh, vh, hb_target=hb_t,
                                       tq_target=tq_t, tk_target=tk_t)  # [B*H, L, dh]
    ctx = ctx.reshape(b * l, d)                                           # contiguous -> free

    out = out_proj_layernorm(ctx, w_o_t, params["bo"], xf,
                             params["ln_gamma"], params["ln_beta"], tm_target=tm_t)
    return out.reshape(b, l, d)


# ----------------------------------------------------------------------------
# Deterministic parameter init (mimics nn.Linear default U(-1/sqrt(fan_in), ...))
# ----------------------------------------------------------------------------
def init_params(key, dim_model):
    def lin(k, dout, din):
        kw, kb = jax.random.split(k)
        bound = 1.0 / math.sqrt(din)
        w = jax.random.uniform(kw, (dout, din), jnp.float32, -bound, bound)
        b = jax.random.uniform(kb, (dout,), jnp.float32, -bound, bound)
        return w, b

    k1, k2, k3, k4 = jax.random.split(key, 4)
    wq, bq = lin(k1, dim_model, dim_model)
    wk, bk = lin(k2, dim_model, dim_model)
    wv, bv = lin(k3, dim_model, dim_model)
    wo, bo = lin(k4, dim_model, dim_model)
    return {
        "wq": wq, "bq": bq,
        "wk": wk, "bk": bk,
        "wv": wv, "bv": bv,
        "wo": wo, "bo": bo,
        "ln_gamma": jnp.ones((dim_model,), jnp.float32),
        "ln_beta": jnp.zeros((dim_model,), jnp.float32),
    }


# ----------------------------------------------------------------------------
# Pure-JAX f32 reference (for correctness check)
# ----------------------------------------------------------------------------
def reference(x, params, num_head):
    b, l, d = x.shape
    dh = d // num_head
    q = x @ params["wq"].T + params["bq"]
    k = x @ params["wk"].T + params["bk"]
    v = x @ params["wv"].T + params["bv"]
    qh = q.reshape(b * num_head, -1, dh)
    kh = k.reshape(b * num_head, -1, dh)
    vh = v.reshape(b * num_head, -1, dh)
    scale = dh ** (-0.5)
    attn = jax.nn.softmax(jnp.einsum("bqd,bkd->bqk", qh, kh) * scale, axis=-1)
    ctx = jnp.einsum("bqk,bkd->bqd", attn, vh).reshape(b, -1, d)
    out = ctx @ params["wo"].T + params["bo"] + x
    mean = out.mean(-1, keepdims=True)
    var = ((out - mean) ** 2).mean(-1, keepdims=True)
    return (out - mean) / jnp.sqrt(var + 1e-5) * params["ln_gamma"] + params["ln_beta"]


if __name__ == "__main__":
    key = jax.random.PRNGKey(0)
    k_x, k_p, k_x2 = jax.random.split(key, 3)

    # --- small config (module-scale smoke test) ---
    dim_model, num_head, batch, seq = 32, 4, 2, 8
    x = jax.random.normal(k_x, (batch, seq, dim_model), jnp.float32)
    params = init_params(k_p, dim_model)
    out = jax.block_until_ready(multi_head_attention(x, params, num_head))
    ref = reference(x, params, num_head)
    assert out.shape == (batch, seq, dim_model)
    # bf16 MXU inputs + approx reciprocal -> loosened tolerance vs the f32 reference.
    assert jnp.allclose(out, ref, atol=5e-2, rtol=5e-2), \
        float(jnp.max(jnp.abs(out - ref)))

    # --- second config: forces multiple head blocks, q tiles and kv steps so the
    #     online-softmax accumulation / multi-tile paths are actually exercised. ---
    b2, l2, d2, h2 = 2, 64, 128, 4
    x2 = jax.random.normal(k_x2, (b2, l2, d2), jnp.float32)
    params2 = init_params(jax.random.PRNGKey(1), d2)
    out2 = jax.block_until_ready(
        multi_head_attention(x2, params2, h2, tiles=(4, 16, 16, 64)))
    ref2 = reference(x2, params2, h2)
    assert out2.shape == (b2, l2, d2)
    assert jnp.allclose(out2, ref2, atol=5e-2, rtol=5e-2), \
        float(jnp.max(jnp.abs(out2 - ref2)))

    print("KERNEL_OK")
</pallas_src>

<mosaic_0001>
module attributes {stable_mosaic.version = 11 : i64} {
  func.func @_qkv_kernel(%arg0: i32, %arg1: i32, %arg2: memref<16x32xbf16, #tpu.memory_space<vmem>>, %arg3: memref<1x32x32xbf16, #tpu.memory_space<vmem>>, %arg4: memref<1x1x32xf32, #tpu.memory_space<vmem>>, %arg5: memref<1x16x32xbf16, #tpu.memory_space<vmem>>) attributes {dimension_semantics = [#tpu.dimension_semantics<parallel>, #tpu.dimension_semantics<parallel>], iteration_bounds = array<i64: 3, 1>, scalar_prefetch = 0 : i64, scratch_operands = 0 : i64, tpu.core_type = #tpu.core_type<tc>, window_params = [{transform_indices = @transform_0, window_bounds = array<i64: 16, 32>}, {transform_indices = @transform_1, window_bounds = array<i64: 1, 32, 32>}, {transform_indices = @transform_2, window_bounds = array<i64: 1, 1, 32>}, {transform_indices = @transform_3, window_bounds = array<i64: 1, 16, 32>}]} {
    %c0 = arith.constant 0 : index
    %c0_0 = arith.constant 0 : index
    %0 = vector.load %arg2[%c0, %c0_0] : memref<16x32xbf16, #tpu.memory_space<vmem>>, vector<16x32xbf16>
    %c0_1 = arith.constant 0 : index
    %c0_2 = arith.constant 0 : index
    %c0_3 = arith.constant 0 : index
    %1 = vector.load %arg3[%c0_1, %c0_2, %c0_3] : memref<1x32x32xbf16, #tpu.memory_space<vmem>>, vector<1x32x32xbf16>
    %2 = vector.shape_cast %1 : vector<1x32x32xbf16> to vector<32x32xbf16>
    %cst = arith.constant dense<0.000000e+00> : vector<16x32xf32>
    %3 = tpu.matmul %0, %2, %cst {dimension_numbers = #tpu.dot_dimension_numbers<[1], [0], [0], [1], [0, 0, 1, 1], [], []>} : vector<16x32xbf16>, vector<32x32xbf16>, vector<16x32xf32> -> vector<16x32xf32>
    %c0_4 = arith.constant 0 : index
    %c0_5 = arith.constant 0 : index
    %c0_6 = arith.constant 0 : index
    %4 = vector.load %arg4[%c0_4, %c0_5, %c0_6] : memref<1x1x32xf32, #tpu.memory_space<vmem>>, vector<1x1x32xf32>
    %5 = vector.shape_cast %4 : vector<1x1x32xf32> to vector<1x32xf32>
    %6 = vector.broadcast %5 : vector<1x32xf32> to vector<16x32xf32>
    %7 = arith.addf %3, %6 : vector<16x32xf32>
    %8 = arith.truncf %7 : vector<16x32xf32> to vector<16x32xbf16>
    %c0_7 = arith.constant 0 : index
    %c0_8 = arith.constant 0 : index
    %c0_9 = arith.constant 0 : index
    %9 = vector.load %arg5[%c0_7, %c0_8, %c0_9] : memref<1x16x32xbf16, #tpu.memory_space<vmem>>, vector<1x16x32xbf16>
    %10 = vector.shape_cast %9 : vector<1x16x32xbf16> to vector<16x32xbf16>
    %11 = vector.shape_cast %8 : vector<16x32xbf16> to vector<1x16x32xbf16>
    tpu.vector_store %arg5[%c0_7, %c0_8, %c0_9], %11 {strides = array<i32>} : memref<1x16x32xbf16, #tpu.memory_space<vmem>>, vector<1x16x32xbf16>,
    return
  }
  func.func @transform_0(%arg0: i32, %arg1: i32) -> (i32, i32) {
    %c0_i32 = arith.constant 0 : i32
    %c0_i32_0 = arith.constant 0 : i32
    return %arg1, %c0_i32 : i32, i32
  }
  func.func @transform_1(%arg0: i32, %arg1: i32) -> (i32, i32, i32) {
    %c0_i32 = arith.constant 0 : i32
    %c0_i32_0 = arith.constant 0 : i32
    %c0_i32_1 = arith.constant 0 : i32
    return %arg0, %c0_i32, %c0_i32_0 : i32, i32, i32
  }
  func.func @transform_2(%arg0: i32, %arg1: i32) -> (i32, i32, i32) {
    %c0_i32 = arith.constant 0 : i32
    %c0_i32_0 = arith.constant 0 : i32
    %c0_i32_1 = arith.constant 0 : i32
    return %arg0, %c0_i32, %c0_i32_0 : i32, i32, i32
  }
  func.func @transform_3(%arg0: i32, %arg1: i32) -> (i32, i32, i32) {
    %c0_i32 = arith.constant 0 : i32
    %c0_i32_0 = arith.constant 0 : i32
    return %arg0, %arg1, %c0_i32 : i32, i32, i32
  }
}

module attributes {stable_mosaic.version = 11 : i64} {
  func.func @_flash_mha_kernel(%arg0: i32, %arg1: i32, %arg2: i32, %arg3: memref<8x8x8xbf16, #tpu.memory_space<vmem>>, %arg4: memref<8x8x8xbf16, #tpu.memory_space<vmem>>, %arg5: memref<8x8x8xbf16, #tpu.memory_space<vmem>>, %arg6: memref<8x8x8xbf16, #tpu.memory_space<vmem>>, %arg7: memref<8x8x1xf32, #tpu.memory_space<vmem>>, %arg8: memref<8x8x1xf32, #tpu.memory_space<vmem>>, %arg9: memref<8x8x8xf32, #tpu.memory_space<vmem>>) attributes {dimension_semantics = [#tpu.dimension_semantics<parallel>, #tpu.dimension_semantics<parallel>, #tpu.dimension_semantics<arbitrary>], iteration_bounds = array<i64: 1, 1, 1>, scalar_prefetch = 0 : i64, scratch_operands = 3 : i64, tpu.core_type = #tpu.core_type<tc>, window_params = [{transform_indices = @transform_0, window_bounds = array<i64: 8, 8, 8>}, {transform_indices = @transform_1, window_bounds = array<i64: 8, 8, 8>}, {transform_indices = @transform_2, window_bounds = array<i64: 8, 8, 8>}, {transform_indices = @transform_3, window_bounds = array<i64: 8, 8, 8>}]} {
    %c0_i32 = arith.constant 0 : i32
    %0 = arith.cmpi eq, %arg2, %c0_i32 : i32
    %1 = arith.extui %0 : i1 to i32
    %c0_i32_0 = arith.constant 0 : i32
    %2 = arith.cmpi ne, %1, %c0_i32_0 : i32
    scf.if %2 {
      %cst_32 = arith.constant 0xFF800000 : f32
      %34 = vector.broadcast %cst_32 : f32 to vector<8x8x1xf32>
      %c0_33 = arith.constant 0 : index
      %c0_34 = arith.constant 0 : index
      %c0_35 = arith.constant 0 : index
      %35 = vector.load %arg7[%c0_33, %c0_34, %c0_35] : memref<8x8x1xf32, #tpu.memory_space<vmem>>, vector<8x8x1xf32>
      tpu.vector_store %arg7[%c0_33, %c0_34, %c0_35], %34 {strides = array<i32>} : memref<8x8x1xf32, #tpu.memory_space<vmem>>, vector<8x8x1xf32>,
      %cst_36 = arith.constant 0.000000e+00 : f32
      %36 = vector.broadcast %cst_36 : f32 to vector<8x8x1xf32>
      %c0_37 = arith.constant 0 : index
      %c0_38 = arith.constant 0 : index
      %c0_39 = arith.constant 0 : index
      %37 = vector.load %arg8[%c0_37, %c0_38, %c0_39] : memref<8x8x1xf32, #tpu.memory_space<vmem>>, vector<8x8x1xf32>
      tpu.vector_store %arg8[%c0_37, %c0_38, %c0_39], %36 {strides = array<i32>} : memref<8x8x1xf32, #tpu.memory_space<vmem>>, vector<8x8x1xf32>,
      %cst_40 = arith.constant 0.000000e+00 : f32
      %38 = vector.broadcast %cst_40 : f32 to vector<8x8x8xf32>
      %c0_41 = arith.constant 0 : index
      %c0_42 = arith.constant 0 : index
      %c0_43 = arith.constant 0 : index
      %39 = vector.load %arg9[%c0_41, %c0_42, %c0_43] : memref<8x8x8xf32, #tpu.memory_space<vmem>>, vector<8x8x8xf32>
      tpu.vector_store %arg9[%c0_41, %c0_42, %c0_43], %38 {strides = array<i32>} : memref<8x8x8xf32, #tpu.memory_space<vmem>>, vector<8x8x8xf32>,
    } else {
    }
    %c0 = arith.constant 0 : index
    %c0_1 = arith.constant 0 : index
    %c0_2 = arith.constant 0 : index
    %3 = vector.load %arg3[%c0, %c0_1, %c0_2] : memref<8x8x8xbf16, #tpu.memory_space<vmem>>, vector<8x8x8xbf16>
    %c0_3 = arith.constant 0 : index
    %c0_4 = arith.constant 0 : index
    %c0_5 = arith.constant 0 : index
    %4 = vector.load %arg4[%c0_3, %c0_4, %c0_5] : memref<8x8x8xbf16, #tpu.memory_space<vmem>>, vector<8x8x8xbf16>
    "tpu.trace_start"() <{level = 10 : i32, message = "hqd,hkd->hqk"}> : () -> ()
    %cst = arith.constant dense<0.000000e+00> : vector<8x8x8xf32>
    %5 = tpu.matmul %3, %4, %cst {dimension_numbers = #tpu.dot_dimension_numbers<[2], [2], [1], [1], [0, 0, 0, 1, 1, 1], [0], [0]>} : vector<8x8x8xbf16>, vector<8x8x8xbf16>, vector<8x8x8xf32> -> vector<8x8x8xf32>
    "tpu.trace_stop"() : () -> ()
    %c0_6 = arith.constant 0 : index
    %c0_7 = arith.constant 0 : index
    %c0_8 = arith.constant 0 : index
    %6 = vector.load %arg7[%c0_6, %c0_7, %c0_8] : memref<8x8x1xf32, #tpu.memory_space<vmem>>, vector<8x8x1xf32>
    %cst_9 = arith.constant dense<0xFF800000> : vector<8x8xf32>
    %7 = vector.multi_reduction <maximumf>, %5, %cst_9 [2] : vector<8x8x8xf32> to vector<8x8xf32>
    %8 = vector.shape_cast %7 : vector<8x8xf32> to vector<8x8x1xf32>
    %9 = arith.maximumf %6, %8 : vector<8x8x1xf32>
    %10 = arith.subf %6, %9 : vector<8x8x1xf32>
    %11 = math.exp %10 : vector<8x8x1xf32>
    %12 = vector.broadcast %9 : vector<8x8x1xf32> to vector<8x8x8xf32>
    %13 = arith.subf %5, %12 : vector<8x8x8xf32>
    %14 = arith.truncf %13 : vector<8x8x8xf32> to vector<8x8x8xbf16>
    %15 = math.exp %14 : vector<8x8x8xbf16>
    %16 = arith.extf %15 : vector<8x8x8xbf16> to vector<8x8x8xf32>
    %cst_10 = arith.constant dense<0.000000e+00> : vector<8x8xf32>
    %17 = vector.multi_reduction <add>, %16, %cst_10 [2] : vector<8x8x8xf32> to vector<8x8xf32>
    %18 = vector.shape_cast %17 : vector<8x8xf32> to vector<8x8x1xf32>
    %c0_11 = arith.constant 0 : index
    %c0_12 = arith.constant 0 : index
    %c0_13 = arith.constant 0 : index
    %19 = vector.load %arg8[%c0_11, %c0_12, %c0_13] : memref<8x8x1xf32, #tpu.memory_space<vmem>>, vector<8x8x1xf32>
    %20 = arith.mulf %11, %19 : vector<8x8x1xf32>
    %21 = arith.addf %20, %18 : vector<8x8x1xf32>
    %c0_14 = arith.constant 0 : index
    %c0_15 = arith.constant 0 : index
    %c0_16 = arith.constant 0 : index
    %22 = vector.load %arg8[%c0_14, %c0_15, %c0_16] : memref<8x8x1xf32, #tpu.memory_space<vmem>>, vector<8x8x1xf32>
    tpu.vector_store %arg8[%c0_14, %c0_15, %c0_16], %21 {strides = array<i32>} : memref<8x8x1xf32, #tpu.memory_space<vmem>>, vector<8x8x1xf32>,
    %c0_17 = arith.constant 0 : index
    %c0_18 = arith.constant 0 : index
    %c0_19 = arith.constant 0 : index
    %23 = vector.load %arg9[%c0_17, %c0_18, %c0_19] : memref<8x8x8xf32, #tpu.memory_space<vmem>>, vector<8x8x8xf32>
    %24 = vector.broadcast %11 : vector<8x8x1xf32> to vector<8x8x8xf32>
    %25 = arith.mulf %24, %23 : vector<8x8x8xf32>
    %c0_20 = arith.constant 0 : index
    %c0_21 = arith.constant 0 : index
    %c0_22 = arith.constant 0 : index
    %26 = vector.load %arg5[%c0_20, %c0_21, %c0_22] : memref<8x8x8xbf16, #tpu.memory_space<vmem>>, vector<8x8x8xbf16>
    "tpu.trace_start"() <{level = 10 : i32, message = "hqk,hkd->hqd"}> : () -> ()
    %cst_23 = arith.constant dense<0.000000e+00> : vector<8x8x8xf32>
    %27 = tpu.matmul %15, %26, %cst_23 {dimension_numbers = #tpu.dot_dimension_numbers<[2], [1], [1], [2], [0, 0, 0, 1, 1, 2], [0], [0]>} : vector<8x8x8xbf16>, vector<8x8x8xbf16>, vector<8x8x8xf32> -> vector<8x8x8xf32>
    "tpu.trace_stop"() : () -> ()
    %28 = arith.addf %25, %27 : vector<8x8x8xf32>
    %c0_24 = arith.constant 0 : index
    %c0_25 = arith.constant 0 : index
    %c0_26 = arith.constant 0 : index
    %29 = vector.load %arg9[%c0_24, %c0_25, %c0_26] : memref<8x8x8xf32, #tpu.memory_space<vmem>>, vector<8x8x8xf32>
    tpu.vector_store %arg9[%c0_24, %c0_25, %c0_26], %28 {strides = array<i32>} : memref<8x8x8xf32, #tpu.memory_space<vmem>>, vector<8x8x8xf32>,
    %c0_27 = arith.constant 0 : index
    %c0_28 = arith.constant 0 : index
    %c0_29 = arith.constant 0 : index
    %30 = vector.load %arg7[%c0_27, %c0_28, %c0_29] : memref<8x8x1xf32, #tpu.memory_space<vmem>>, vector<8x8x1xf32>
    tpu.vector_store %arg7[%c0_27, %c0_28, %c0_29], %9 {strides = array<i32>} : memref<8x8x1xf32, #tpu.memory_space<vmem>>, vector<8x8x1xf32>,
    %c0_i32_30 = arith.constant 0 : i32
    %31 = arith.cmpi eq, %arg2, %c0_i32_30 : i32
    %32 = arith.extui %31 : i1 to i32
    %c0_i32_31 = arith.constant 0 : i32
    %33 = arith.cmpi ne, %32, %c0_i32_31 : i32
    scf.if %33 {
      %c0_32 = arith.constant 0 : index
      %c0_33 = arith.constant 0 : index
      %c0_34 = arith.constant 0 : index
      %34 = vector.load %arg8[%c0_32, %c0_33, %c0_34] : memref<8x8x1xf32, #tpu.memory_space<vmem>>, vector<8x8x1xf32>
      %35 = tpu.reciprocal %34 {approx = true} : vector<8x8x1xf32> -> vector<8x8x1xf32>
      %c0_35 = arith.constant 0 : index
      %c0_36 = arith.constant 0 : index
      %c0_37 = arith.constant 0 : index
      %36 = vector.load %arg9[%c0_35, %c0_36, %c0_37] : memref<8x8x8xf32, #tpu.memory_space<vmem>>, vector<8x8x8xf32>
      %37 = vector.broadcast %35 : vector<8x8x1xf32> to vector<8x8x8xf32>
      %38 = arith.mulf %36, %37 : vector<8x8x8xf32>
      %39 = arith.truncf %38 : vector<8x8x8xf32> to vector<8x8x8xbf16>
      %c0_38 = arith.constant 0 : index
      %c0_39 = arith.constant 0 : index
      %c0_40 = arith.constant 0 : index
      %40 = vector.load %arg6[%c0_38, %c0_39, %c0_40] : memref<8x8x8xbf16, #tpu.memory_space<vmem>>, vector<8x8x8xbf16>
      tpu.vector_store %arg6[%c0_38, %c0_39, %c0_40], %39 {strides = array<i32>} : memref<8x8x8xbf16, #tpu.memory_space<vmem>>, vector<8x8x8xbf16>,
    } else {
    }
    return
  }
  func.func @transform_0(%arg0: i32, %arg1: i32, %arg2: i32) -> (i32, i32, i32) {
    %c0_i32 = arith.constant 0 : i32
    %c0_i32_0 = arith.constant 0 : i32
    return %arg0, %arg1, %c0_i32 : i32, i32, i32
  }
  func.func @transform_1(%arg0: i32, %arg1: i32, %arg2: i32) -> (i32, i32, i32) {
    %c0_i32 = arith.constant 0 : i32
    %c0_i32_0 = arith.constant 0 : i32
    return %arg0, %arg2, %c0_i32 : i32, i32, i32
  }
  func.func @transform_2(%arg0: i32, %arg1: i32, %arg2: i32) -> (i32, i32, i32) {
    %c0_i32 = arith.constant 0 : i32
    %c0_i32_0 = arith.constant 0 : i32
    return %arg0, %arg2, %c0_i32 : i32, i32, i32
  }
  func.func @transform_3(%arg0: i32, %arg1: i32, %arg2: i32) -> (i32, i32, i32) {
    %c0_i32 = arith.constant 0 : i32
    %c0_i32_0 = arith.constant 0 : i32
    return %arg0, %arg1, %c0_i32 : i32, i32, i32
  }
}

module attributes {stable_mosaic.version = 11 : i64} {
  func.func @_out_ln_kernel(%arg0: i32, %arg1: memref<16x32xbf16, #tpu.memory_space<vmem>>, %arg2: memref<32x32xbf16, #tpu.memory_space<vmem>>, %arg3: memref<1x32xf32, #tpu.memory_space<vmem>>, %arg4: memref<16x32xf32, #tpu.memory_space<vmem>>, %arg5: memref<1x32xf32, #tpu.memory_space<vmem>>, %arg6: memref<1x32xf32, #tpu.memory_space<vmem>>, %arg7: memref<16x32xf32, #tpu.memory_space<vmem>>) attributes {dimension_semantics = [#tpu.dimension_semantics<parallel>], iteration_bounds = array<i64: 1>, scalar_prefetch = 0 : i64, scratch_operands = 0 : i64, tpu.core_type = #tpu.core_type<tc>, window_params = [{transform_indices = @transform_0, window_bounds = array<i64: 16, 32>}, {pipeline_mode = #tpu.pipeline_mode<synchronous>, transform_indices = @transform_1, window_bounds = array<i64: 32, 32>}, {pipeline_mode = #tpu.pipeline_mode<synchronous>, transform_indices = @transform_2, window_bounds = array<i64: 1, 32>}, {transform_indices = @transform_3, window_bounds = array<i64: 16, 32>}, {pipeline_mode = #tpu.pipeline_mode<synchronous>, transform_indices = @transform_4, window_bounds = array<i64: 1, 32>}, {pipeline_mode = #tpu.pipeline_mode<synchronous>, transform_indices = @transform_5, window_bounds = array<i64: 1, 32>}, {transform_indices = @transform_6, window_bounds = array<i64: 16, 32>}]} {
    %c0 = arith.constant 0 : index
    %c0_0 = arith.constant 0 : index
    %0 = vector.load %arg1[%c0, %c0_0] : memref<16x32xbf16, #tpu.memory_space<vmem>>, vector<16x32xbf16>
    %c0_1 = arith.constant 0 : index
    %c0_2 = arith.constant 0 : index
    %1 = vector.load %arg2[%c0_1, %c0_2] : memref<32x32xbf16, #tpu.memory_space<vmem>>, vector<32x32xbf16>
    %cst = arith.constant dense<0.000000e+00> : vector<16x32xf32>
    %2 = tpu.matmul %0, %1, %cst {dimension_numbers = #tpu.dot_dimension_numbers<[1], [0], [0], [1], [0, 0, 1, 1], [], []>} : vector<16x32xbf16>, vector<32x32xbf16>, vector<16x32xf32> -> vector<16x32xf32>
    %c0_3 = arith.constant 0 : index
    %c0_4 = arith.constant 0 : index
    %3 = vector.load %arg3[%c0_3, %c0_4] : memref<1x32xf32, #tpu.memory_space<vmem>>, vector<1x32xf32>
    %4 = vector.broadcast %3 : vector<1x32xf32> to vector<16x32xf32>
    %5 = arith.addf %2, %4 : vector<16x32xf32>
    %c0_5 = arith.constant 0 : index
    %c0_6 = arith.constant 0 : index
    %6 = vector.load %arg4[%c0_5, %c0_6] : memref<16x32xf32, #tpu.memory_space<vmem>>, vector<16x32xf32>
    %7 = arith.addf %5, %6 : vector<16x32xf32>
    %cst_7 = arith.constant dense<0.000000e+00> : vector<16xf32>
    %8 = vector.multi_reduction <add>, %7, %cst_7 [1] : vector<16x32xf32> to vector<16xf32>
    %9 = vector.shape_cast %8 : vector<16xf32> to vector<16x1xf32>
    %cst_8 = arith.constant 3.200000e+01 : f32
    %10 = vector.broadcast %cst_8 : f32 to vector<16x1xf32>
    %11 = arith.divf %9, %10 : vector<16x1xf32>
    %12 = vector.broadcast %11 : vector<16x1xf32> to vector<16x32xf32>
    %13 = arith.subf %7, %12 : vector<16x32xf32>
    %14 = arith.mulf %13, %13 : vector<16x32xf32>
    %cst_9 = arith.constant dense<0.000000e+00> : vector<16xf32>
    %15 = vector.multi_reduction <add>, %14, %cst_9 [1] : vector<16x32xf32> to vector<16xf32>
    %16 = vector.shape_cast %15 : vector<16xf32> to vector<16x1xf32>
    %cst_10 = arith.constant 3.200000e+01 : f32
    %17 = vector.broadcast %cst_10 : f32 to vector<16x1xf32>
    %18 = arith.divf %16, %17 : vector<16x1xf32>
    %19 = vector.broadcast %11 : vector<16x1xf32> to vector<16x32xf32>
    %20 = arith.subf %7, %19 : vector<16x32xf32>
    %cst_11 = arith.constant 9.99999974E-6 : f32
    %21 = vector.broadcast %cst_11 : f32 to vector<16x1xf32>
    %22 = arith.addf %18, %21 : vector<16x1xf32>
    %23 = math.rsqrt %22 : vector<16x1xf32>
    %24 = vector.broadcast %23 : vector<16x1xf32> to vector<16x32xf32>
    %25 = arith.mulf %20, %24 : vector<16x32xf32>
    %c0_12 = arith.constant 0 : index
    %c0_13 = arith.constant 0 : index
    %26 = vector.load %arg5[%c0_12, %c0_13] : memref<1x32xf32, #tpu.memory_space<vmem>>, vector<1x32xf32>
    %27 = vector.broadcast %26 : vector<1x32xf32> to vector<16x32xf32>
    %28 = arith.mulf %25, %27 : vector<16x32xf32>
    %c0_14 = arith.constant 0 : index
    %c0_15 = arith.constant 0 : index
    %29 = vector.load %arg6[%c0_14, %c0_15] : memref<1x32xf32, #tpu.memory_space<vmem>>, vector<1x32xf32>
    %30 = vector.broadcast %29 : vector<1x32xf32> to vector<16x32xf32>
    %31 = arith.addf %28, %30 : vector<16x32xf32>
    %c0_16 = arith.constant 0 : index
    %c0_17 = arith.constant 0 : index
    %32 = vector.load %arg7[%c0_16, %c0_17] : memref<16x32xf32, #tpu.memory_space<vmem>>, vector<16x32xf32>
    tpu.vector_store %arg7[%c0_16, %c0_17], %31 {strides = array<i32>} : memref<16x32xf32, #tpu.memory_space<vmem>>, vector<16x32xf32>,
    return
  }
  func.func @transform_0(%arg0: i32) -> (i32, i32) {
    %c0_i32 = arith.constant 0 : i32
    %c0_i32_0 = arith.constant 0 : i32
    return %arg0, %c0_i32 : i32, i32
  }
  func.func @transform_1(%arg0: i32) -> (i32, i32) {
    %c0_i32 = arith.constant 0 : i32
    %c0_i32_0 = arith.constant 0 : i32
    %c0_i32_1 = arith.constant 0 : i32
    return %c0_i32, %c0_i32_0 : i32, i32
  }
  func.func @transform_2(%arg0: i32) -> (i32, i32) {
    %c0_i32 = arith.constant 0 : i32
    %c0_i32_0 = arith.constant 0 : i32
    %c0_i32_1 = arith.constant 0 : i32
    return %c0_i32, %c0_i32_0 : i32, i32
  }
  func.func @transform_3(%arg0: i32) -> (i32, i32) {
    %c0_i32 = arith.constant 0 : i32
    %c0_i32_0 = arith.constant 0 : i32
    return %arg0, %c0_i32 : i32, i32
  }
  func.func @transform_4(%arg0: i32) -> (i32, i32) {
    %c0_i32 = arith.constant 0 : i32
    %c0_i32_0 = arith.constant 0 : i32
    %c0_i32_1 = arith.constant 0 : i32
    return %c0_i32, %c0_i32_0 : i32, i32
  }
  func.func @transform_5(%arg0: i32) -> (i32, i32) {
    %c0_i32 = arith.constant 0 : i32
    %c0_i32_0 = arith.constant 0 : i32
    %c0_i32_1 = arith.constant 0 : i32
    return %c0_i32, %c0_i32_0 : i32, i32
  }
  func.func @transform_6(%arg0: i32) -> (i32, i32) {
    %c0_i32 = arith.constant 0 : i32
    %c0_i32_0 = arith.constant 0 : i32
    return %arg0, %c0_i32 : i32, i32
  }
}

</mosaic_0001>

<bundles_post_ra>
// kernel: squeeze.3
= control target key start
LH: loop header
LB: loop body
LE: loop exit
PB: predicated region body
PF: predicated region fallthrough
CT: control target
= control target key end

     0   :  { %vm35_vm0 = vcmask 64512   ;;  %s206_s8 = smov 104   ;;  %s207_s9 = smov 112   ;;  %s241_s0 = inlined_call_operand.vmem [shape: bf16[1,16,32], index: 0, kind: input, shape index: {}]   ;;  %s242_s1 = inlined_call_operand.vmem [shape: bf16[8,8,8], index: 1, kind: output, shape index: {}]  }
   0x1   :  { %v161_v0 = vld [vmem:[%s241_s0] sm:$0xff]   ;;  %s205_s0 = smov 120  }
   0x2   :  { %v162_v1 = vunpack.c.l.bf16 %v161_v0  ;;  %v163_v2 = vunpack.c.h.bf16 %v161_v0 }
   0x4   :  { %41 = vst.msk [vmem:[#allocation0 + $0x20] ss:$4 sm:$0xff] %vm35_vm0, %v163_v2   ;;  %v190_v3 = vpack.i.bf16 %v163_v2, %v162_v1  ;;  %36 = vst.msk [vmem:[#allocation0] ss:$4 sm:$0xff] %vm35_vm0, %v162_v1  }
   0x6   :  { %191 = vrot.lane.b32.xlu0 %v190_v3, %s205_s0  ;;  %201 = vrot.lane.b32.xlu1 %v190_v3, %s206_s8 }
   0xa   :  { %196 = vrot.lane.b32.xlu0 %v190_v3, %s207_s9 }
  0x78   :  { %v192_v4 = vpop.permute.xlu0 %191  ;;  %v202_v5 = vpop.permute.xlu1 %201 }
  0x79   :  { %v194_v6 = vunpack.i.h.bf16 %v192_v4  ;;  %v193_v7 = vunpack.i.l.bf16 %v192_v4  ;;  %v204_v8 = vunpack.i.h.bf16 %v202_v5  ;;  %v203_v9 = vunpack.i.l.bf16 %v202_v5 }
  0x7b   :  { %54 = vst.msk [vmem:[#allocation0 + $0x21] ss:$4 sm:$0xff] %vm35_vm0, %v194_v6   ;;  %47 = vst.msk [vmem:[#allocation0 + $0x1] ss:$4 sm:$0xff] %vm35_vm0, %v193_v7  }
  0x7c   :  { %80 = vst.msk [vmem:[#allocation0 + $0x23] ss:$4 sm:$0xff] %vm35_vm0, %v204_v8   ;;  %73 = vst.msk [vmem:[#allocation0 + $0x3] ss:$4 sm:$0xff] %vm35_vm0, %v203_v9   ;;  %v197_v10 = vpop.permute.xlu0 %196 }
  0x7d   :  { %v199_v11 = vunpack.i.h.bf16 %v197_v10  ;;  %v198_v12 = vunpack.i.l.bf16 %v197_v10 }
  0x7f   :  { %67 = vst.msk [vmem:[#allocation0 + $0x22] ss:$4 sm:$0xff] %vm35_vm0, %v199_v11   ;;  %60 = vst.msk [vmem:[#allocation0 + $0x2] ss:$4 sm:$0xff] %vm35_vm0, %v198_v12  }
  0x86   :  { %v86_v13 = vld [vmem:[#allocation0] sm:$0xff]  ;;  %v92_v14 = vld [vmem:[#allocation0 + $0x8] sm:$0xff]  ;;  %v99_v15 = vld [vmem:[#allocation0 + $0x10] sm:$0xff] }
  0x87   :  { %v167_v16 = vpack.c.bf16 %v92_v14, %v86_v13  ;;  %v107_v17 = vld [vmem:[#allocation0 + $0x18] sm:$0xff]  ;;  %v115_v18 = vld [vmem:[#allocation0 + $0x20] sm:$0xff]  ;;  %v123_v19 = vld [vmem:[#allocation0 + $0x28] sm:$0xff] }
  0x88   :  { %v172_v20 = vpack.c.bf16 %v107_v17, %v99_v15  ;;  %v177_v21 = vpack.c.bf16 %v123_v19, %v115_v18  ;;  %v131_v22 = vld [vmem:[#allocation0 + $0x30] sm:$0xff]  ;;  %v139_v23 = vld [vmem:[#allocation0 + $0x38] sm:$0xff] }
  0x89   :  { %168 = vst [vmem:[%s242_s1] sm:$0xff] %v167_v16   ;;  %v182_v24 = vpack.c.bf16 %v139_v23, %v131_v22 }
  0x8a   :  { %184 = vst [vmem:[%s242_s1 + $0x8] sm:$0xff] %v172_v20   ;;  %185 = vst [vmem:[%s242_s1 + $0x10] sm:$0xff] %v177_v21  }
  0x8b   :  { %186 = vst [vmem:[%s242_s1 + $0x18] sm:$0xff] %v182_v24  }

// kernel: multi_head_attention.3
= control target key start
LH: loop header
LB: loop body
LE: loop exit
PB: predicated region body
PF: predicated region fallthrough
CT: control target
= control target key end

     0   :  { %s531_s12 = smov 0   ;;  %s533_s13 = smov 0   ;;  %s570_s0 = inlined_call_operand.vmem [shape: bf16[16,32], index: 0, kind: input, shape index: {}]   ;;  %s571_s1 = inlined_call_operand.vmem [shape: bf16[3,32,32], index: 1, kind: input, shape index: {}]   ;;  %s572_s2 = inlined_call_operand.vmem [shape: f32[3,1,32], index: 2, kind: input, shape index: {}]   ;;  %s573_s3 = inlined_call_operand.vmem [shape: bf16[3,16,32], index: 3, kind: output, shape index: {}]  }
   0x1   :  { %s535_s14 = smov 0  }
   0x2 LB: > { %s25_s15 = sadd.s32 1, %s503_s13  ;;  %p427_p0 = scmp.ge.s32.totalorder %s507_s14, 1  ;;  %s507_s14 = sphi %s535_s14, %s13_s14   ;;  %s503_s13 = sphi %s533_s13, %s575_s13   ;;  %s499_s12 = sphi %s531_s12, %s574_s12  }
   0x3   : > { %p27_p1 = scmp.ge.s32.totalorder %s25_s15, 3  ;;  %p170_p2 = scmp.lt.s32.totalorder %s507_s14, 4 }
   0x5   : > { %s577_s15 = smov (%p27_p1, %s25_s15), 0  ;;  %p171_p3 = pnand %p427_p0, %p170_p2 }
   0x6   : > { %p212_p4 = scmp.lt.s32.totalorder (!%p171_p3), %s499_s12, 2 }
   0x7   : > { %174 = sbr.rel (%p171_p3) target bundleno = 225 (0xe1), region = 32 }
   0xc   : > { %v509_v0 = vmov 0.0   ;;  %vm510_vm0 = vmmov 0   ;;  %s579_s12 = smov (!%p212_p4, %s499_s12), 2  ;;  %v484_v3 = vld [vmem:[%s570_s0] sm:$0xff]   ;;  %vm261_vm1 = vcmask 261120   ;;  %vm314_vm2 = vcmask 257024  }
   0xd   : > { %448 = vmatprep.subr.bf16.mxu0 %v509_v0  ;;  %452 = vmatprep.mubr.msk.bf16.mxu0 %vm510_vm0, %v509_v0  ;;  %s441_s16 = sshll.u32 %s579_s12, 4  ;;  %s219_s24 = scalar_lea.vmem %s572_s2, %s579_s12 }
   0xe   : > { %s216_s19 = scalar_lea.vmem %s571_s1, %s441_s16  ;;  %v432_v4 = vld [vmem:[%s219_s24] ss:$0 sm:$0xff]  ;;  %s442_s25 = sshll.u32 %s579_s12, 3 }
   0xf   : > { %v482_v1 = vld [vmem:[%s216_s19 + $0x8] sm:$0xff]   ;;  %v483_v2 = vld [vmem:[%s216_s19] sm:$0xff]   ;;  %s228_s28 = scalar_lea.vmem %s573_s3, %s442_s25 }
  0x10   : > { %449 = vmatpush3.bf16.msra.mxu0 %v482_v1 }
  0x11   : > { %450 = vmatprep.subr.bf16.mxu0 %v509_v0 }
  0x14   : > { %451 = vmatpush3.bf16.msra.mxu0 %v483_v2 }
  0x17   : > { %453 = vmatmul.mubr.msk.bf16.vlgmr.msra.gmra.mxu0 %vm261_vm1, %v484_v3 }
  0xd7   : > { %v299_v5 = vpop.f32.mrf.mxu0 }
  0xd8   : > { %v300_v6 = vadd.f32 %v432_v4, %v299_v5 }
  0xd9   : > { %v454_v7 = vpop.f32.mrf.mxu0 }
  0xda   : > { %v443_v8 = vpack.c.bf16 %v300_v6, %v300_v6 }
  0xdb   : > { %v302_v9 = vpop.f32.mrf.mxu0 }
  0xdc   : > { %315 = vst.msk [vmem:[%s228_s28] sm:$0xf] %vm314_vm2, %v443_v8  ;;  %v303_v10 = vadd.f32 %v432_v4, %v302_v9 }
  0xdd   : > { %v455_v11 = vpop.f32.mrf.mxu0 }
  0xde   : > { %v444_v12 = vpack.c.bf16 %v303_v10, %v303_v10 }
  0xe0   : > { %316 = vst.msk [vmem:[%s228_s28 + $0x4] sm:$0xf] %vm314_vm2, %v444_v12 }
  0xe1 PF: > { %s13_s14 = sadd.s32 1, %s507_s14   ;;  %s574_s12 = smov %s503_s13 }
  0xe2   : > { %p10_p5 = scmp.ge.s32.totalorder %s13_s14, 5   ;;  %s575_s13 = smov %s577_s15 }
  0xe4   :  { %12 = sbr.rel (!%p10_p5) target bundleno = 2 (0x2), region = 68 }

// kernel: multi_head_attention.5
= control target key start
LH: loop header
LB: loop body
LE: loop exit
PB: predicated region body
PF: predicated region fallthrough
CT: control target
= control target key end

     0   :  { %v219_v1 = vmov 0.0   ;;  %vm220_vm0 = vmmov 0   ;;  %s293_s0 = inlined_call_operand.vmem [shape: bf16[16,32], index: 0, kind: input, shape index: {}]   ;;  %s294_s1 = inlined_call_operand.vmem [shape: bf16[32,32], index: 1, kind: input, shape index: {}]   ;;  %s295_s2 = inlined_call_operand.vmem [shape: f32[1,32], index: 2, kind: input, shape index: {}]   ;;  %s296_s3 = inlined_call_operand.vmem [shape: f32[16,32], index: 3, kind: input, shape index: {}]   ;;  %s297_s4 = inlined_call_operand.vmem [shape: f32[1,32], index: 4, kind: input, shape index: {}]   ;;  %s298_s5 = inlined_call_operand.vmem [shape: f32[1,32], index: 5, kind: input, shape index: {}]   ;;  %s299_s6 = inlined_call_operand.hbm [shape: f32[16,32], index: 6, kind: output, shape index: {}]  }
   0x1   :  { %v190_v0 = vld [vmem:[%s294_s1 + $0x8] sm:$0xff]   ;;  %177 = vmatprep.subr.bf16.mxu0 %v219_v1  ;;  %v191_v2 = vld [vmem:[%s294_s1] sm:$0xff]   ;;  %181 = vmatprep.mubr.msk.bf16.mxu0 %vm220_vm0, %v219_v1 }
   0x2   :  { %178 = vmatpush3.bf16.msra.mxu0 %v190_v0 }
   0x3   :  { %179 = vmatprep.subr.bf16.mxu0 %v219_v1 }
   0x4   :  { %11 = vsyncpa [#allocation3], 0  ;;  %v192_v3 = vld [vmem:[%s293_s0] sm:$0xff]   ;;  %vm55_vm1 = vcmask 261120   ;;  %v101_v11 = vld [vmem:[%s296_s3 + $0x8] sm:$0xff]  ;;  %s221_s9 = smov [#allocation2]  }
   0x5   :  { %v167_v4 = vld [vmem:[%s295_s2] ss:$0 sm:$0xff]  ;;  %s156_s10 = sshll.u32 %s221_s9, 4  ;;  %s157_s10 = int_to_ptr.vmem [resolvable:$true] %s156_s10 }
   0x6   :  { %180 = vmatpush3.bf16.msra.mxu0 %v191_v2  ;;  %v100_v6 = vld [vmem:[%s296_s3] sm:$0xff]  ;;  %s197_s11 = scalar_lea.vmem %s157_s10, 256  ;;  %p202_p1 = scmp.lt.s32.totalorder %s157_s10, %s157_s10 }
   0x7   :  { %v172_v34 = vld [vmem:[%s297_s4] ss:$0 sm:$0xff]  ;;  %p198_p0 = scmp.ne.s32.totalorder %s157_s10, %s197_s11  ;;  %p203_p2 = scmp.lt.s32.totalorder %s197_s11, %s197_s11 }
   0x8   :  { %v173_v36 = vld [vmem:[%s298_s5] ss:$0 sm:$0xff] }
   0x9   :  { %182 = vmatmul.mubr.msk.bf16.vlgmr.msra.gmra.mxu0 %vm55_vm1, %v192_v3  ;;  %p204_p3 = por %p203_p2, %p202_p1 }
   0xb   :  { %p205_p4 = pnand %p204_p3, %p198_p0 }
  0xc9   :  { %v93_v5 = vpop.f32.mrf.mxu0 }
  0xca   :  { %v94_v7 = vadd.f32 %v167_v4, %v93_v5 }
  0xcb   :  { %v183_v8 = vpop.f32.mrf.mxu0 }
  0xcc   :  { %v102_v9 = vadd.f32 %v100_v6, %v94_v7 }
  0xcd   :  { %v96_v10 = vpop.f32.mrf.mxu0 }
  0xce   :  { %v97_v12 = vadd.f32 %v167_v4, %v96_v10  ;;  %v104_v13 = vsel %vm55_vm1, %v102_v9, 0.0 }
  0xcf   :  { %105 = vadd.xlane.f32.xlu0 %v104_v13  ;;  %v184_v14 = vpop.f32.mrf.mxu0 }
  0xd0   :  { %v103_v15 = vadd.f32 %v101_v11, %v97_v12 }
  0xd2   :  { %v107_v16 = vsel %vm55_vm1, %v103_v15, 0.0 }
  0xd3   :  { %108 = vadd.xlane.f32.xlu0 %v107_v16 }
 0x158   :  { %v106_v17 = vpop.xlane.xlu0 %105 }
 0x159   :  { %v111_v18 = vmul.f32 0.03125, %v106_v17 }
 0x15b   :  { %v113_v19 = vsub.f32 %v102_v9, %v111_v18 }
 0x15c   :  { %v109_v20 = vpop.xlane.xlu0 %108 }
 0x15d   :  { %v112_v21 = vmul.f32 0.03125, %v109_v20  ;;  %v115_v22 = vmul.f32 %v113_v19, %v113_v19 }
 0x15f   :  { %v114_v23 = vsub.f32 %v103_v15, %v112_v21  ;;  %v117_v24 = vsel %vm55_vm1, %v115_v22, 0.0 }
 0x160   :  { %118 = vadd.xlane.f32.xlu1 %v117_v24 }
 0x161   :  { %v116_v25 = vmul.f32 %v114_v23, %v114_v23 }
 0x163   :  { %v120_v26 = vsel %vm55_vm1, %v116_v25, 0.0 }
 0x164   :  { %121 = vadd.xlane.f32.xlu1 %v120_v26 }
 0x1e9   :  { %v119_v27 = vpop.xlane.xlu1 %118 }
 0x1ea   :  { %v123_v28 = vmul.f32 0.03125, %v119_v27 }
 0x1ec   :  { %v125_v29 = vadd.f32 1e-05, %v123_v28 }
 0x1ed   :  { %v122_v30 = vpop.xlane.xlu1 %121 }
 0x1ee   :  { %193 = vrsqrt.f32 %v125_v29  ;;  %v124_v31 = vmul.f32 0.03125, %v122_v30 }
 0x1f0   :  { %v126_v32 = vadd.f32 1e-05, %v124_v31 }
 0x1f2   :  { %195 = vrsqrt.f32 %v126_v32 }
 0x1fb   :  { %v194_v33 = vpop.eup %193 }
 0x1fc   :  { %v129_v35 = vmul.f32 %v194_v33, %v113_v19 }
 0x1fe   :  { %v138_v37 = vmul.f32 %v172_v34, %v129_v35 }
 0x1ff   :  { %v196_v38 = vpop.eup %195 }
 0x200   :  { %v130_v39 = vmul.f32 %v196_v38, %v114_v23  ;;  %v147_v40 = vadd.f32 %v173_v36, %v138_v37 }
 0x202   :  { %v139_v41 = vmul.f32 %v172_v34, %v130_v39  ;;  %149 = vst.msk [vmem:[#allocation2] sm:$0xff] %vm55_vm1, %v147_v40 }
 0x204   :  { %v148_v42 = vadd.f32 %v173_v36, %v139_v41 }
 0x206   :  { %150 = vst.msk [vmem:[#allocation2 + $0x8] sm:$0xff] %vm55_vm1, %v148_v42 }
 0x207   :  { %208 = shalt.err (!%p205_p4)
}
 0x208   :  { %s222_s4 = smov 128   ;;  %s223_s5 = smov 8  }
 0x209   :  { %162 = dma.vmem_to_hbm [thread:$0]  %s157_s10, 256, %s299_s6, [#allocation3], %s222_s4, %s222_s4, %s223_s5  }
 0x20a   :  { %217 = dma.done.wait [#allocation3], 256  }
 0x20b   :  { %218 = vsyncadd [#allocation3], 4294967040 }
 0x20c   :  { %166 = vsyncpa [#allocation3], 1 }

// kernel: multi_head_attention.4
= control target key start
LH: loop header
LB: loop body
LE: loop exit
PB: predicated region body
PF: predicated region fallthrough
CT: control target
= control target key end

     0   :  { %vm36_vm0 = vcmask 64512   ;;  %v1390_v0 = vmov 0.0   ;;  %vm1391_vm1 = vmmov 0   ;;  %vm19_vm2 = vcmask 7168   ;;  %s1818_s1 = inlined_call_operand.vmem [shape: bf16[8,8,8], index: 1, kind: input, shape index: {}]   ;;  %s1819_s0 = inlined_call_operand.vmem [shape: bf16[8,8,8], index: 0, kind: input, shape index: {}]   ;;  %s1820_s2 = inlined_call_operand.vmem [shape: bf16[8,8,8], index: 2, kind: input, shape index: {}]   ;;  %s1821_s3 = inlined_call_operand.vmem [shape: bf16[8,8,8], index: 3, kind: output, shape index: {}]  }
   0x1   :  { %1240 = vmatprep.subr.bf16.mxu0 %v1390_v0  ;;  %1246 = vmatprep.subr.bf16.mxu1 %v1390_v0  ;;  %v53_v1 = vld [vmem:[%s1818_s1] sm:$0xf]  ;;  %37 = vst.msk [vmem:[#allocation4] sm:$0xff] %vm36_vm0, %v1390_v0  ;;  %38 = vst.msk [vmem:[#allocation4 + $0x8] sm:$0xff] %vm36_vm0, %v1390_v0  ;;  %v54_v2 = vld [vmem:[%s1818_s1 + $0x4] sm:$0xf] }
   0x2   :  { %39 = vst.msk [vmem:[#allocation4 + $0x10] sm:$0xff] %vm36_vm0, %v1390_v0  ;;  %40 = vst.msk [vmem:[#allocation4 + $0x18] sm:$0xff] %vm36_vm0, %v1390_v0  ;;  %v66_v3 = vsel %vm36_vm0, %v53_v1, 0  ;;  %v112_v4 = vsel %vm36_vm0, %v54_v2, 0  ;;  %1242 = vmatprep.mubr.msk.bf16.mxu0 %vm1391_vm1, %v1390_v0  ;;  %1248 = vmatprep.mubr.msk.bf16.mxu1 %vm1391_vm1, %v1390_v0  ;;  %v55_v5 = vld [vmem:[%s1818_s1 + $0x8] sm:$0xf] }
   0x3   :  { %41 = vst.msk [vmem:[#allocation4 + $0x20] sm:$0xff] %vm36_vm0, %v1390_v0  ;;  %42 = vst.msk [vmem:[#allocation4 + $0x28] sm:$0xff] %vm36_vm0, %v1390_v0  ;;  %1241 = vmatpush3.bf16.xpose.msra.mxu0 %v66_v3  ;;  %1247 = vmatpush3.bf16.xpose.msra.mxu1 %v112_v4  ;;  %v56_v6 = vld [vmem:[%s1818_s1 + $0xc] sm:$0xf]  ;;  %v45_v7 = vld [vmem:[%s1819_s0] sm:$0xf] }
   0x4   :  { %43 = vst.msk [vmem:[#allocation4 + $0x30] sm:$0xff] %vm36_vm0, %v1390_v0  ;;  %44 = vst.msk [vmem:[#allocation4 + $0x38] sm:$0xff] %vm36_vm0, %v1390_v0  ;;  %1252 = vmatprep.subr.bf16.mxu0 %v1390_v0  ;;  %1258 = vmatprep.subr.bf16.mxu1 %v1390_v0  ;;  %v46_v8 = vld [vmem:[%s1819_s0 + $0x4] sm:$0xf]  ;;  %v158_v9 = vsel %vm36_vm0, %v55_v5, 0  ;;  %v204_v10 = vsel %vm36_vm0, %v56_v6, 0 }
   0x5   :  { %v57_v11 = vld [vmem:[%s1818_s1 + $0x10] sm:$0xf]  ;;  %v58_v12 = vld [vmem:[%s1818_s1 + $0x14] sm:$0xf]  ;;  %v47_v13 = vld [vmem:[%s1819_s0 + $0x8] sm:$0xf] }
   0x6   :  { %v48_v14 = vld [vmem:[%s1819_s0 + $0xc] sm:$0xf]  ;;  %v250_v15 = vsel %vm36_vm0, %v57_v11, 0  ;;  %v296_v16 = vsel %vm36_vm0, %v58_v12, 0  ;;  %v59_v17 = vld [vmem:[%s1818_s1 + $0x18] sm:$0xf] }
   0x7   :  { %v60_v18 = vld [vmem:[%s1818_s1 + $0x1c] sm:$0xf]  ;;  %v49_v19 = vld [vmem:[%s1819_s0 + $0x10] sm:$0xf]  ;;  %v50_v20 = vld [vmem:[%s1819_s0 + $0x14] sm:$0xf] }
   0x8   :  { %v342_v21 = vsel %vm36_vm0, %v59_v17, 0  ;;  %v388_v22 = vsel %vm36_vm0, %v60_v18, 0  ;;  %v51_v23 = vld [vmem:[%s1819_s0 + $0x18] sm:$0xf]  ;;  %v52_v24 = vld [vmem:[%s1819_s0 + $0x1c] sm:$0xf] }
   0x9   :  { %v1392_v25 = vmov -inf   ;;  %28 = vst.msk [vmem:[#allocation3] sm:$0xff] %vm19_vm2, %v1390_v0  ;;  %29 = vst.msk [vmem:[#allocation3 + $0x8] sm:$0xff] %vm19_vm2, %v1390_v0  ;;  %v1393_v44 = vmov 0   ;;  %vm706_vm3 = vcmask 1043456   ;;  %vm1179_vm4 = vcmask 60416  }
   0xa   :  { %1243 = vmatmul.mubr.msk.bf16.vlgmr.msra.gmra.mxu0 %vm36_vm0, %v45_v7  ;;  %1249 = vmatmul.mubr.msk.bf16.vlgmr.msra.gmra.mxu1 %vm36_vm0, %v46_v8  ;;  %20 = vst.msk [vmem:[#allocation2] sm:$0xff] %vm19_vm2, %v1392_v25  ;;  %21 = vst.msk [vmem:[#allocation2 + $0x8] sm:$0xff] %vm19_vm2, %v1392_v25 }
   0xb   :  { %1253 = vmatpush3.bf16.xpose.msra.mxu0 %v158_v9  ;;  %1259 = vmatpush3.bf16.xpose.msra.mxu1 %v204_v10  ;;  %22 = vst.msk [vmem:[#allocation2 + $0x10] sm:$0xff] %vm19_vm2, %v1392_v25  ;;  %23 = vst.msk [vmem:[#allocation2 + $0x18] sm:$0xff] %vm19_vm2, %v1392_v25 }
   0xc   :  { %1254 = vmatprep.mubr.msk.bf16.mxu0 %vm1391_vm1, %v1390_v0  ;;  %1260 = vmatprep.mubr.msk.bf16.mxu1 %vm1391_vm1, %v1390_v0  ;;  %24 = vst.msk [vmem:[#allocation2 + $0x20] sm:$0xff] %vm19_vm2, %v1392_v25  ;;  %25 = vst.msk [vmem:[#allocation2 + $0x28] sm:$0xff] %vm19_vm2, %v1392_v25 }
   0xd   :  { %1264 = vmatprep.subr.bf16.mxu0 %v1390_v0  ;;  %1270 = vmatprep.subr.bf16.mxu1 %v1390_v0  ;;  %26 = vst.msk [vmem:[#allocation2 + $0x30] sm:$0xff] %vm19_vm2, %v1392_v25  ;;  %27 = vst.msk [vmem:[#allocation2 + $0x38] sm:$0xff] %vm19_vm2, %v1392_v25 }
   0xe   :  { %30 = vst.msk [vmem:[#allocation3 + $0x10] sm:$0xff] %vm19_vm2, %v1390_v0  ;;  %31 = vst.msk [vmem:[#allocation3 + $0x18] sm:$0xff] %vm19_vm2, %v1390_v0  ;;  %1340 = vset.pattern.permute.xlu0 %v1393_v44  ;;  %1341 = vset.pattern.permute.xlu1 %v1393_v44 }
   0xf   :  { %32 = vst.msk [vmem:[#allocation3 + $0x20] sm:$0xff] %vm19_vm2, %v1390_v0  ;;  %33 = vst.msk [vmem:[#allocation3 + $0x28] sm:$0xff] %vm19_vm2, %v1390_v0 }
  0x10   :  { %34 = vst.msk [vmem:[#allocation3 + $0x30] sm:$0xff] %vm19_vm2, %v1390_v0  ;;  %35 = vst.msk [vmem:[#allocation3 + $0x38] sm:$0xff] %vm19_vm2, %v1390_v0 }
  0x11   :  { %v1580_v4 = vld [vmem:[#allocation2] sm:$0xff]  ;;  %v1585_v7 = vld [vmem:[#allocation2 + $0x8] sm:$0xff] }
  0x12   :  { %1255 = vmatmul.mubr.msk.bf16.vlgmr.msra.gmra.mxu0 %vm36_vm0, %v47_v13  ;;  %1261 = vmatmul.mubr.msk.bf16.vlgmr.msra.gmra.mxu1 %vm36_vm0, %v48_v14  ;;  %v1595_v11 = vld [vmem:[#allocation2 + $0x10] sm:$0xff] }
  0x13   :  { %1265 = vmatpush3.bf16.xpose.msra.mxu0 %v250_v15  ;;  %1271 = vmatpush3.bf16.xpose.msra.mxu1 %v296_v16  ;;  %v1605_v15 = vld [vmem:[#allocation2 + $0x18] sm:$0xff] }
  0x14   :  { %1266 = vmatprep.mubr.msk.bf16.mxu0 %vm1391_vm1, %v1390_v0  ;;  %1272 = vmatprep.mubr.msk.bf16.mxu1 %vm1391_vm1, %v1390_v0 }
  0x15   :  { %1276 = vmatprep.subr.bf16.mxu0 %v1390_v0  ;;  %1282 = vmatprep.subr.bf16.mxu1 %v1390_v0 }
  0x1a   :  { %1267 = vmatmul.mubr.msk.bf16.vlgmr.msra.gmra.mxu0 %vm36_vm0, %v49_v19  ;;  %1273 = vmatmul.mubr.msk.bf16.vlgmr.msra.gmra.mxu1 %vm36_vm0, %v50_v20  ;;  %v1615_v19 = vld [vmem:[#allocation2 + $0x20] sm:$0xff]  ;;  %v1617_v20 = vld [vmem:[#allocation2 + $0x28] sm:$0xff] }
  0x1b   :  { %1277 = vmatpush3.bf16.xpose.msra.mxu0 %v342_v21  ;;  %1283 = vmatpush3.bf16.xpose.msra.mxu1 %v388_v22  ;;  %v695_v22 = vld [vmem:[%s1820_s2] sm:$0xf] }
  0x1c   :  { %1278 = vmatprep.mubr.msk.bf16.mxu0 %vm1391_vm1, %v1390_v0  ;;  %1284 = vmatprep.mubr.msk.bf16.mxu1 %vm1391_vm1, %v1390_v0  ;;  %v708_v25 = vsel %vm706_vm3, %v695_v22, 0 }
  0x1d   :  { %1288 = vmatprep.subr.bf16.mxu0 %v1390_v0  ;;  %1294 = vmatprep.subr.bf16.mxu1 %v1390_v0 }
  0x22   :  { %1279 = vmatmul.mubr.msk.bf16.vlgmr.msra.gmra.mxu0 %vm36_vm0, %v51_v23  ;;  %1285 = vmatmul.mubr.msk.bf16.vlgmr.msra.gmra.mxu1 %vm36_vm0, %v52_v24 }
  0x23   :  { %1290 = vmatprep.mubr.msk.bf16.mxu0 %vm1391_vm1, %v1390_v0  ;;  %1296 = vmatprep.mubr.msk.bf16.mxu1 %vm1391_vm1, %v1390_v0 }
  0x24   :  { %1289 = vmatpush3.bf16.msra.mxu0 %v708_v25 }
  0x25   :  { %1300 = vmatprep.subr.bf16.mxu0 %v1390_v0 }
  0xca   :  { %v1548_v26 = vpop.f32.mrf.mxu0  ;;  %v1550_v27 = vpop.f32.mrf.mxu1 }
  0xcb   :  { %v438_v28 = vsel %vm36_vm0, %v1548_v26, -inf  ;;  %v441_v31 = vsel %vm36_vm0, %v1550_v27, -inf }
  0xcc   :  { %v1250_v29 = vpop.f32.mrf.mxu1  ;;  %439 = vmax.xlane.f32.xlu0 %v438_v28  ;;  %v1244_v30 = vpop.f32.mrf.mxu0 }
  0xce   :  { %v105_v32 = vpop.f32.mrf.mxu0  ;;  %v151_v33 = vpop.f32.mrf.mxu1 }
  0xcf   :  { %v696_v32 = vld [vmem:[%s1820_s2 + $0x4] sm:$0xf] }
  0xd0   :  { %v1251_v34 = vpop.f32.mrf.mxu1  ;;  %442 = vmax.xlane.f32.xlu0 %v441_v31  ;;  %v1245_v35 = vpop.f32.mrf.mxu0  ;;  %v754_v33 = vsel %vm706_vm3, %v696_v32, 0 }
  0xd1   :  { %1295 = vmatpush3.bf16.msra.mxu1 %v754_v33  ;;  %v1648_v34 = vld [vmem:[#allocation2 + $0x30] sm:$0xff]  ;;  %v1650_v35 = vld [vmem:[#allocation2 + $0x38] sm:$0xff] }
  0xd2   :  { %v1556_v36 = vpop.f32.mrf.mxu0  ;;  %v1558_v37 = vpop.f32.mrf.mxu1  ;;  %1306 = vmatprep.subr.bf16.mxu1 %v1390_v0 }
  0xd3   :  { %v444_v38 = vsel %vm36_vm0, %v1556_v36, -inf  ;;  %v447_v41 = vsel %vm36_vm0, %v1558_v37, -inf }
  0xd4   :  { %v1262_v39 = vpop.f32.mrf.mxu1  ;;  %445 = vmax.xlane.f32.xlu1 %v444_v38  ;;  %v1256_v40 = vpop.f32.mrf.mxu0  ;;  %v697_v38 = vld [vmem:[%s1820_s2 + $0x8] sm:$0xf] }
  0xd6   :  { %v197_v42 = vpop.f32.mrf.mxu0  ;;  %v243_v43 = vpop.f32.mrf.mxu1 }
  0xd8   :  { %v1263_v45 = vpop.f32.mrf.mxu1  ;;  %448 = vmax.xlane.f32.xlu1 %v447_v41  ;;  %v1257_v46 = vpop.f32.mrf.mxu0  ;;  %v800_v41 = vsel %vm706_vm3, %v697_v38, 0 }
  0xd9   :  { %v698_v46 = vld [vmem:[%s1820_s2 + $0xc] sm:$0xf] }
  0xda   :  { %v1564_v47 = vpop.f32.mrf.mxu0  ;;  %v1566_v48 = vpop.f32.mrf.mxu1 }
  0xdb   :  { %v450_v49 = vsel %vm36_vm0, %v1564_v47, -inf  ;;  %v453_v50 = vsel %vm36_vm0, %v1566_v48, -inf }
  0xdc   :  { %v1274_v51 = vpop.f32.mrf.mxu1  ;;  %451 = vmax.xlane.f32.xlu0 %v450_v49  ;;  %v1268_v52 = vpop.f32.mrf.mxu0  ;;  %454 = vmax.xlane.f32.xlu1 %v453_v50  ;;  %v846_v49 = vsel %vm706_vm3, %v698_v46, 0  ;;  %v699_v50 = vld [vmem:[%s1820_s2 + $0x10] sm:$0xf] }
  0xdd   :  { %v1682_v51 = vsel %vm706_vm3, %v699_v50, 0  ;;  %v700_v52 = vld [vmem:[%s1820_s2 + $0x14] sm:$0xf] }
  0xde   :  { %v289_v53 = vpop.f32.mrf.mxu0  ;;  %v335_v54 = vpop.f32.mrf.mxu1 }
  0xdf   :  { %v1688_v53 = vsel %vm706_vm3, %v700_v52, 0  ;;  %v701_v54 = vld [vmem:[%s1820_s2 + $0x18] sm:$0xf] }
  0xe0   :  { %v1275_v55 = vpop.f32.mrf.mxu1  ;;  %v1269_v56 = vpop.f32.mrf.mxu0 }
  0xe1   :  { %v1694_v55 = vsel %vm706_vm3, %v701_v54, 0  ;;  %v702_v56 = vld [vmem:[%s1820_s2 + $0x1c] sm:$0xf] }
  0xe2   :  { %v1572_v57 = vpop.f32.mrf.mxu0  ;;  %v1574_v58 = vpop.f32.mrf.mxu1 }
  0xe3   :  { %v456_v59 = vsel %vm36_vm0, %v1572_v57, -inf  ;;  %v459_v60 = vsel %vm36_vm0, %v1574_v58, -inf }
  0xe4   :  { %v1286_v61 = vpop.f32.mrf.mxu1  ;;  %457 = vmax.xlane.f32.xlu0 %v456_v59  ;;  %v1280_v62 = vpop.f32.mrf.mxu0  ;;  %460 = vmax.xlane.f32.xlu1 %v459_v60  ;;  %v1700_v59 = vsel %vm706_vm3, %v702_v56, 0 }
  0xe6   :  { %v381_v63 = vpop.f32.mrf.mxu0  ;;  %v427_v1 = vpop.f32.mrf.mxu1 }
  0xe8   :  { %v1287_v2 = vpop.f32.mrf.mxu1  ;;  %v1281_v3 = vpop.f32.mrf.mxu0 }
 0x155   :  { %v440_v5 = vpop.xlane.xlu0 %439 }
 0x156   :  { %v1583_v6 = vmax.f32 %v1580_v4, %v440_v5 }
 0x158   :  { %v470_v8 = vsub.f32 %v1580_v4, %v1583_v6  ;;  %1088 = vst.msk [vmem:[#allocation2] sm:$0xff] %vm19_vm2, %v1583_v6  ;;  %496 = vperm.xlu0 %1340, %v1583_v6  }
 0x159   :  { %v443_v9 = vpop.xlane.xlu0 %442 }
 0x15a   :  { %v1593_v10 = vmax.f32 %v1585_v7, %v443_v9 }
 0x15c   :  { %v471_v12 = vsub.f32 %v1585_v7, %v1593_v10  ;;  %1089 = vst.msk [vmem:[#allocation2 + $0x8] sm:$0xff] %vm19_vm2, %v1593_v10  ;;  %501 = vperm.xlu1 %1341, %v1593_v10  }
 0x15d   :  { %v446_v13 = vpop.xlane.xlu1 %445 }
 0x15e   :  { %v1603_v14 = vmax.f32 %v1595_v11, %v446_v13 }
 0x160   :  { %v472_v16 = vsub.f32 %v1595_v11, %v1603_v14  ;;  %1090 = vst.msk [vmem:[#allocation2 + $0x10] sm:$0xff] %vm19_vm2, %v1603_v14  ;;  %506 = vperm.xlu1 %1341, %v1603_v14  }
 0x161   :  { %v449_v17 = vpop.xlane.xlu1 %448 }
 0x162   :  { %v1613_v18 = vmax.f32 %v1605_v15, %v449_v17 }
 0x164   :  { %v473_v21 = vsub.f32 %v1605_v15, %v1613_v18  ;;  %1091 = vst.msk [vmem:[#allocation2 + $0x18] sm:$0xff] %vm19_vm2, %v1613_v18  ;;  %511 = vperm.xlu1 %1341, %v1613_v18  }
 0x165   :  { %v452_v23 = vpop.xlane.xlu0 %451  ;;  %v455_v24 = vpop.xlane.xlu1 %454 }
 0x166   :  { %v1629_v28 = vmax.f32 %v1615_v19, %v452_v23  ;;  %v1632_v29 = vmax.f32 %v1617_v20, %v455_v24 }
 0x168   :  { %v474_v30 = vsub.f32 %v1615_v19, %v1629_v28  ;;  %1092 = vst.msk [vmem:[#allocation2 + $0x20] sm:$0xff] %vm19_vm2, %v1629_v28  ;;  %516 = vperm.xlu1 %1341, %v1629_v28   ;;  %v475_v31 = vsub.f32 %v1617_v20, %v1632_v29  ;;  %1093 = vst.msk [vmem:[#allocation2 + $0x28] sm:$0xff] %vm19_vm2, %v1632_v29  ;;  %v606_v20 = vld [vmem:[#allocation3] sm:$0xff] }
 0x16a   :  { %v486_v7 = vmul.f32 1.442695, %v474_v30  ;;  %v488_v4 = vmul.f32 1.442695, %v475_v31 }
 0x16c   :  { %521 = vperm.xlu1 %1341, %v1632_v29   ;;  %v607_v29 = vld [vmem:[#allocation3 + $0x8] sm:$0xff] }
 0x16d   :  { %v458_v39 = vpop.xlane.xlu0 %457  ;;  %v461_v40 = vpop.xlane.xlu1 %460 }
 0x16e   :  { %v1659_v42 = vmax.f32 %v1648_v34, %v458_v39  ;;  %v1662_v43 = vmax.f32 %v1650_v35, %v461_v40 }
 0x170   :  { %v476_v44 = vsub.f32 %v1648_v34, %v1659_v42  ;;  %1094 = vst.msk [vmem:[#allocation2 + $0x30] sm:$0xff] %vm19_vm2, %v1659_v42  ;;  %526 = vperm.xlu1 %1341, %v1659_v42   ;;  %v477_v45 = vsub.f32 %v1650_v35, %v1662_v43  ;;  %1095 = vst.msk [vmem:[#allocation2 + $0x38] sm:$0xff] %vm19_vm2, %v1662_v43  ;;  %v608_v35 = vld [vmem:[#allocation3 + $0x10] sm:$0xff] }
 0x172   :  { %v490_v6 = vmul.f32 1.442695, %v476_v44 }
 0x174   :  { %531 = vperm.xlu1 %1341, %v1662_v43  }
 0x1d3   :  { %v497_v60 = vpop.permute.xlu0 %496 }
 0x1d4   :  { %v534_v61 = vsub.f32 %v1548_v26, %v497_v60 }
 0x1d6   :  { %v542_v62 = vpack.c.bf16 %v534_v61, %v534_v61 }
 0x1d7   :  { %v502_v63 = vpop.permute.xlu1 %501 }
 0x1d8   :  { %v551_v1 = vmul.bf16 1069105081, %v542_v62  ;;  %v535_v2 = vsub.f32 %v1550_v27, %v502_v63 }
 0x1da   :  { %1342 = vpow.bf16 %v551_v1  ;;  %v543_v3 = vpack.c.bf16 %v535_v2, %v535_v2 }
 0x1db   :  { %v507_v5 = vpop.permute.xlu1 %506 }
 0x1dc   :  { %v554_v9 = vmul.bf16 1069105081, %v543_v3  ;;  %v536_v13 = vsub.f32 %v1556_v36, %v507_v5 }
 0x1de   :  { %1344 = vpow.bf16 %v554_v9  ;;  %v544_v17 = vpack.c.bf16 %v536_v13, %v536_v13 }
 0x1df   :  { %v512_v22 = vpop.permute.xlu1 %511 }
 0x1e0   :  { %v557_v23 = vmul.bf16 1069105081, %v544_v17  ;;  %v537_v24 = vsub.f32 %v1558_v37, %v512_v22 }
 0x1e2   :  { %1346 = vpow.bf16 %v557_v23  ;;  %v545_v25 = vpack.c.bf16 %v537_v24, %v537_v24 }
 0x1e3   :  { %v517_v26 = vpop.permute.xlu1 %516 }
 0x1e4   :  { %v560_v32 = vmul.bf16 1069105081, %v545_v25  ;;  %v538_v33 = vsub.f32 %v1564_v47, %v517_v26 }
 0x1e6   :  { %1348 = vpow.bf16 %v560_v32  ;;  %v546_v27 = vpack.c.bf16 %v538_v33, %v538_v33  ;;  %v478_v33 = vmul.f32 1.442695, %v470_v8  ;;  %v492_v8 = vmul.f32 1.442695, %v477_v45  ;;  %v609_v45 = vld [vmem:[#allocation3 + $0x18] sm:$0xff] }
 0x1e7   :  { %v522_v38 = vpop.permute.xlu1 %521 }
 0x1e8   :  { %v1343_v39 = vpop.eup %1342  ;;  %v563_v40 = vmul.bf16 1069105081, %v546_v27  ;;  %v539_v46 = vsub.f32 %v1566_v48, %v522_v38  ;;  %v482_v27 = vmul.f32 1.442695, %v472_v16  ;;  %v484_v38 = vmul.f32 1.442695, %v473_v21 }
 0x1e9   :  { %1291 = vmatmul.mubr.msk.bf16.vlgmr.msra.gmra.mxu0 %vm36_vm0, %v1343_v39  ;;  %v574_v36 = vunpack.c.l.bf16 %v1343_v39 }
 0x1ea   :  { %1350 = vpow.bf16 %v563_v40  ;;  %v547_v50 = vpack.c.bf16 %v539_v46, %v539_v46  ;;  %1301 = vmatpush3.bf16.msra.mxu0 %v800_v41  ;;  %1302 = vmatprep.mubr.msk.bf16.mxu0 %vm1391_vm1, %v1390_v0 }
 0x1eb   :  { %v527_v37 = vpop.permute.xlu1 %526  ;;  %v582_v52 = vsel %vm36_vm0, %v574_v36, 0.0  ;;  %1312 = vmatprep.subr.bf16.mxu0 %v1390_v0 }
 0x1ec   :  { %v1345_v47 = vpop.eup %1344  ;;  %v566_v54 = vmul.bf16 1069105081, %v547_v50  ;;  %v540_v56 = vsub.f32 %v1572_v57, %v527_v37  ;;  %583 = vadd.xlane.f32.xlu1 %v582_v52  ;;  %v610_v50 = vld [vmem:[#allocation3 + $0x20] sm:$0xff] }
 0x1ed   :  { %1297 = vmatmul.mubr.msk.bf16.vlgmr.msra.gmra.mxu1 %vm36_vm0, %v1345_v47  ;;  %v575_v48 = vunpack.c.l.bf16 %v1345_v47 }
 0x1ee   :  { %1352 = vpow.bf16 %v566_v54  ;;  %v548_v60 = vpack.c.bf16 %v540_v56, %v540_v56  ;;  %1307 = vmatpush3.bf16.msra.mxu1 %v846_v49  ;;  %1308 = vmatprep.mubr.msk.bf16.mxu1 %vm1391_vm1, %v1390_v0  ;;  %v611_v56 = vld [vmem:[#allocation3 + $0x28] sm:$0xff] }
 0x1ef   :  { %v532_v41 = vpop.permute.xlu1 %531  ;;  %v585_v61 = vsel %vm36_vm0, %v575_v48, 0.0  ;;  %1318 = vmatprep.subr.bf16.mxu1 %v1390_v0 }
 0x1f0   :  { %v1347_v62 = vpop.eup %1346  ;;  %v569_v63 = vmul.bf16 1069105081, %v548_v60  ;;  %v541_v1 = vsub.f32 %v1574_v58, %v532_v41  ;;  %586 = vadd.xlane.f32.xlu0 %v585_v61 }
 0x1f1   :  { %1303 = vmatmul.mubr.msk.bf16.vlgmr.msra.gmra.mxu0 %vm36_vm0, %v1347_v62  ;;  %v576_v57 = vunpack.c.l.bf16 %v1347_v62  ;;  %v612_v62 = vld [vmem:[#allocation3 + $0x30] sm:$0xff] }
 0x1f2   :  { %1354 = vpow.bf16 %v569_v63  ;;  %v549_v2 = vpack.c.bf16 %v541_v1, %v541_v1  ;;  %1313 = vmatpush3.bf16.msra.mxu0 %v1682_v51  ;;  %1314 = vmatprep.mubr.msk.bf16.mxu0 %vm1391_vm1, %v1390_v0 }
 0x1f3   :  { %v588_v49 = vsel %vm36_vm0, %v576_v57, 0.0  ;;  %1324 = vmatprep.subr.bf16.mxu0 %v1390_v0 }
 0x1f4   :  { %v1349_v3 = vpop.eup %1348  ;;  %v572_v5 = vmul.bf16 1069105081, %v549_v2  ;;  %589 = vadd.xlane.f32.xlu0 %v588_v49 }
 0x1f5   :  { %1309 = vmatmul.mubr.msk.bf16.vlgmr.msra.gmra.mxu1 %vm36_vm0, %v1349_v3  ;;  %v577_v58 = vunpack.c.l.bf16 %v1349_v3  ;;  %v613_v3 = vld [vmem:[#allocation3 + $0x38] sm:$0xff] }
 0x1f6   :  { %1356 = vpow.bf16 %v572_v5  ;;  %1319 = vmatpush3.bf16.msra.mxu1 %v1688_v53  ;;  %1320 = vmatprep.mubr.msk.bf16.mxu1 %vm1391_vm1, %v1390_v0 }
 0x1f7   :  { %v591_v51 = vsel %vm36_vm0, %v577_v58, 0.0  ;;  %1330 = vmatprep.subr.bf16.mxu1 %v1390_v0 }
 0x1f8   :  { %v1351_v9 = vpop.eup %1350  ;;  %592 = vadd.xlane.f32.xlu1 %v591_v51 }
 0x1f9   :  { %1315 = vmatmul.mubr.msk.bf16.vlgmr.msra.gmra.mxu0 %vm36_vm0, %v1351_v9  ;;  %v578_v13 = vunpack.c.l.bf16 %v1351_v9 }
 0x1fa   :  { %1325 = vmatpush3.bf16.msra.mxu0 %v1694_v55  ;;  %1326 = vmatprep.mubr.msk.bf16.mxu0 %vm1391_vm1, %v1390_v0 }
 0x1fb   :  { %v594_v17 = vsel %vm36_vm0, %v578_v13, 0.0 }
 0x1fc   :  { %v1353_v53 = vpop.eup %1352  ;;  %595 = vadd.xlane.f32.xlu0 %v594_v17 }
 0x1fd   :  { %1321 = vmatmul.mubr.msk.bf16.vlgmr.msra.gmra.mxu1 %vm36_vm0, %v1353_v53  ;;  %v579_v22 = vunpack.c.l.bf16 %v1353_v53 }
 0x1fe   :  { %1331 = vmatpush3.bf16.msra.mxu1 %v1700_v59  ;;  %1332 = vmatprep.mubr.msk.bf16.mxu1 %vm1391_vm1, %v1390_v0  ;;  %v480_v59 = vmul.f32 1.442695, %v471_v12 }
 0x1ff   :  { %v597_v23 = vsel %vm36_vm0, %v579_v22, 0.0 }
 0x200   :  { %v1355_v24 = vpop.eup %1354  ;;  %598 = vadd.xlane.f32.xlu1 %v597_v23  ;;  %1358 = vpow2.f32 %v480_v59  ;;  %v639_v59 = vld [vmem:[#allocation4] sm:$0xff] }
 0x201   :  { %1327 = vmatmul.mubr.msk.bf16.vlgmr.msra.gmra.mxu0 %vm36_vm0, %v1355_v24  ;;  %v580_v55 = vunpack.c.l.bf16 %v1355_v24  ;;  %1360 = vpow2.f32 %v478_v33 }
 0x202   :  { %1362 = vpow2.f32 %v482_v27 }
 0x203   :  { %v600_v25 = vsel %vm36_vm0, %v580_v55, 0.0  ;;  %1364 = vpow2.f32 %v484_v38 }
 0x204   :  { %v1357_v26 = vpop.eup %1356  ;;  %601 = vadd.xlane.f32.xlu0 %v600_v25  ;;  %1366 = vpow2.f32 %v486_v7  ;;  %v640_v7 = vld [vmem:[#allocation4 + $0x8] sm:$0xff] }
 0x205   :  { %1333 = vmatmul.mubr.msk.bf16.vlgmr.msra.gmra.mxu1 %vm36_vm0, %v1357_v26  ;;  %v581_v32 = vunpack.c.l.bf16 %v1357_v26  ;;  %1368 = vpow2.f32 %v488_v4 }
 0x206   :  { %1370 = vpow2.f32 %v490_v6 }
 0x207   :  { %v603_v0 = vsel %vm36_vm0, %v581_v32, 0.0  ;;  %1372 = vpow2.f32 %v492_v8 }
 0x208   :  { %604 = vadd.xlane.f32.xlu1 %v603_v0 }
 0x20d   :  { %v1359_v10 = vpop.eup %1358 }
 0x20e   :  { %v1361_v11 = vpop.eup %1360  ;;  %v615_v31 = vmul.f32 %v1359_v10, %v607_v29 }
 0x20f   :  { %v1363_v12 = vpop.eup %1362  ;;  %v614_v21 = vmul.f32 %v1361_v11, %v606_v20 }
 0x210   :  { %v1365_v14 = vpop.eup %1364  ;;  %v616_v43 = vmul.f32 %v1363_v12, %v608_v35 }
 0x211   :  { %v1367_v15 = vpop.eup %1366  ;;  %v617_v46 = vmul.f32 %v1365_v14, %v609_v45 }
 0x212   :  { %v1369_v16 = vpop.eup %1368  ;;  %v618_v47 = vmul.f32 %v1367_v15, %v610_v50 }
 0x213   :  { %v1371_v18 = vpop.eup %1370  ;;  %v619_v41 = vmul.f32 %v1369_v16, %v611_v56 }
 0x214   :  { %v1373_v19 = vpop.eup %1372  ;;  %v620_v57 = vmul.f32 %v1371_v18, %v612_v62  ;;  %v645_v62 = vld [vmem:[#allocation4 + $0x30] sm:$0xff] }
 0x215   :  { %v621_v51 = vmul.f32 %v1373_v19, %v613_v3 }
 0x219   :  { %654 = vperm.xlu1 %1341, %v1359_v10  }
 0x21a   :  { %649 = vperm.xlu0 %1340, %v1361_v11  }
 0x21d   :  { %659 = vperm.xlu1 %1341, %v1363_v12   ;;  %v641_v12 = vld [vmem:[#allocation4 + $0x10] sm:$0xff] }
 0x21e   :  { %664 = vperm.xlu0 %1340, %v1365_v14  }
 0x221   :  { %669 = vperm.xlu1 %1341, %v1367_v15  }
 0x222   :  { %674 = vperm.xlu0 %1340, %v1369_v16  }
 0x225   :  { %679 = vperm.xlu1 %1341, %v1371_v18  }
 0x226   :  { %684 = vperm.xlu0 %1340, %v1373_v19  }
 0x275   :  { %v584_v28 = vpop.xlane.xlu1 %583 }
 0x276   :  { %v622_v30 = vadd.f32 %v614_v21, %v584_v28  ;;  %v642_v28 = vld [vmem:[#allocation4 + $0x18] sm:$0xff] }
 0x278   :  { %631 = vst.msk [vmem:[#allocation3] sm:$0xff] %vm19_vm2, %v622_v30 }
 0x279   :  { %v587_v34 = vpop.xlane.xlu0 %586 }
 0x27a   :  { %v623_v42 = vadd.f32 %v615_v31, %v587_v34 }
 0x27c   :  { %632 = vst.msk [vmem:[#allocation3 + $0x8] sm:$0xff] %vm19_vm2, %v623_v42 }
 0x27d   :  { %v590_v44 = vpop.xlane.xlu0 %589 }
 0x27e   :  { %v624_v39 = vadd.f32 %v616_v43, %v590_v44  ;;  %v643_v44 = vld [vmem:[#allocation4 + $0x20] sm:$0xff] }
 0x27f   :  { %v1099_v40 = vld [vmem:[#allocation3] sm:$0xff] }
 0x280   :  { %633 = vst.msk [vmem:[#allocation3 + $0x10] sm:$0xff] %vm19_vm2, %v624_v39  ;;  %1374 = vrcp.f32 %v1099_v40 }
 0x281   :  { %v593_v36 = vpop.xlane.xlu1 %592 }
 0x282   :  { %v625_v37 = vadd.f32 %v617_v46, %v593_v36 }
 0x283   :  { %v1100_v52 = vld [vmem:[#allocation3 + $0x8] sm:$0xff] }
 0x284   :  { %634 = vst.msk [vmem:[#allocation3 + $0x18] sm:$0xff] %vm19_vm2, %v625_v37  ;;  %1376 = vrcp.f32 %v1100_v52  ;;  %v644_v52 = vld [vmem:[#allocation4 + $0x28] sm:$0xff] }
 0x285   :  { %v596_v54 = vpop.xlane.xlu0 %595 }
 0x286   :  { %v626_v48 = vadd.f32 %v618_v47, %v596_v54 }
 0x287   :  { %v1101_v60 = vld [vmem:[#allocation3 + $0x10] sm:$0xff] }
 0x288   :  { %635 = vst.msk [vmem:[#allocation3 + $0x20] sm:$0xff] %vm19_vm2, %v626_v48  ;;  %1378 = vrcp.f32 %v1101_v60 }
 0x289   :  { %v599_v61 = vpop.xlane.xlu1 %598 }
 0x28a   :  { %v627_v63 = vadd.f32 %v619_v41, %v599_v61 }
 0x28b   :  { %v1102_v1 = vld [vmem:[#allocation3 + $0x18] sm:$0xff] }
 0x28c   :  { %636 = vst.msk [vmem:[#allocation3 + $0x28] sm:$0xff] %vm19_vm2, %v627_v63  ;;  %1380 = vrcp.f32 %v1102_v1 }
 0x28d   :  { %v1375_v2 = vpop.eup %1374  ;;  %v602_v49 = vpop.xlane.xlu0 %601 }
 0x28e   :  { %v628_v5 = vadd.f32 %v620_v57, %v602_v49  ;;  %1125 = vperm.xlu1 %1341, %v1375_v2  }
 0x28f   :  { %v1103_v58 = vld [vmem:[#allocation3 + $0x20] sm:$0xff] }
 0x290   :  { %637 = vst.msk [vmem:[#allocation3 + $0x30] sm:$0xff] %vm19_vm2, %v628_v5  ;;  %1382 = vrcp.f32 %v1103_v58  ;;  %v646_v58 = vld [vmem:[#allocation4 + $0x38] sm:$0xff] }
 0x291   :  { %v1377_v9 = vpop.eup %1376  ;;  %v605_v13 = vpop.xlane.xlu1 %604 }
 0x292   :  { %v629_v17 = vadd.f32 %v621_v51, %v605_v13  ;;  %1130 = vperm.xlu0 %1340, %v1377_v9  }
 0x293   :  { %v1104_v53 = vld [vmem:[#allocation3 + $0x28] sm:$0xff] }
 0x294   :  { %638 = vst.msk [vmem:[#allocation3 + $0x38] sm:$0xff] %vm19_vm2, %v629_v17  ;;  %1384 = vrcp.f32 %v1104_v53 }
 0x295   :  { %v1379_v22 = vpop.eup %1378  ;;  %v650_v0 = vpop.permute.xlu0 %649 }
 0x296   :  { %1135 = vperm.xlu1 %1341, %v1379_v22   ;;  %v655_v33 = vpop.permute.xlu1 %654  ;;  %v687_v27 = vmul.f32 %v650_v0, %v639_v59 }
 0x297   :  { %v1105_v23 = vld [vmem:[#allocation3 + $0x30] sm:$0xff]  ;;  %v688_v10 = vmul.f32 %v655_v33, %v640_v7 }
 0x298   :  { %1386 = vrcp.f32 %v1105_v23 }
 0x299   :  { %v1381_v24 = vpop.eup %1380  ;;  %v665_v21 = vpop.permute.xlu0 %664 }
 0x29a   :  { %1140 = vperm.xlu0 %1340, %v1381_v24   ;;  %v660_v11 = vpop.permute.xlu1 %659  ;;  %v690_v42 = vmul.f32 %v665_v21, %v642_v28 }
 0x29b   :  { %v1106_v55 = vld [vmem:[#allocation3 + $0x38] sm:$0xff]  ;;  %v689_v20 = vmul.f32 %v660_v11, %v641_v12 }
 0x29c   :  { %1388 = vrcp.f32 %v1106_v55 }
 0x29d   :  { %v1383_v25 = vpop.eup %1382  ;;  %v675_v37 = vpop.permute.xlu0 %674 }
 0x29e   :  { %1145 = vperm.xlu1 %1341, %v1383_v25   ;;  %v670_v43 = vpop.permute.xlu1 %669  ;;  %v692_v41 = vmul.f32 %v675_v37, %v644_v52 }
 0x29f   :  { %v691_v50 = vmul.f32 %v670_v43, %v643_v44 }
 0x2a1   :  { %v1385_v26 = vpop.eup %1384  ;;  %v685_v5 = vpop.permute.xlu0 %684 }
 0x2a2   :  { %1150 = vperm.xlu0 %1340, %v1385_v26   ;;  %v680_v61 = vpop.permute.xlu1 %679  ;;  %v694_v22 = vmul.f32 %v685_v5, %v646_v58 }
 0x2a3   :  { %v693_v3 = vmul.f32 %v680_v61, %v645_v62 }
 0x2a5   :  { %v1387_v32 = vpop.eup %1386 }
 0x2a6   :  { %1155 = vperm.xlu1 %1341, %v1387_v32  }
 0x2a9   :  { %v1389_v38 = vpop.eup %1388  ;;  %v744_v4 = vpop.f32.mrf.mxu0 }
 0x2aa   :  { %v1072_v6 = vadd.f32 %v744_v4, %v687_v27  ;;  %1160 = vperm.xlu0 %1340, %v1389_v38  }
 0x2ab   :  { %v1292_v8 = vpop.f32.mrf.mxu0 }
 0x2ac   :  { %1080 = vst.msk [vmem:[#allocation4] sm:$0xff] %vm36_vm0, %v1072_v6 }
 0x2ad   :  { %v747_v14 = vpop.f32.mrf.mxu0  ;;  %v790_v15 = vpop.f32.mrf.mxu1 }
 0x2ae   :  { %v1073_v16 = vadd.f32 %v790_v15, %v688_v10 }
 0x2af   :  { %v1293_v18 = vpop.f32.mrf.mxu0  ;;  %v1298_v19 = vpop.f32.mrf.mxu1 }
 0x2b0   :  { %1081 = vst.msk [vmem:[#allocation4 + $0x8] sm:$0xff] %vm36_vm0, %v1073_v16 }
 0x2b1   :  { %v793_v29 = vpop.f32.mrf.mxu1  ;;  %v836_v30 = vpop.f32.mrf.mxu0 }
 0x2b2   :  { %v1074_v31 = vadd.f32 %v836_v30, %v689_v20 }
 0x2b3   :  { %v1299_v34 = vpop.f32.mrf.mxu1  ;;  %v1304_v35 = vpop.f32.mrf.mxu0  ;;  %v1115_v33 = vld [vmem:[#allocation4] sm:$0xff] }
 0x2b4   :  { %1082 = vst.msk [vmem:[#allocation4 + $0x10] sm:$0xff] %vm36_vm0, %v1074_v31 }
 0x2b5   :  { %v839_v45 = vpop.f32.mrf.mxu0  ;;  %v882_v39 = vpop.f32.mrf.mxu1 }
 0x2b6   :  { %v1075_v40 = vadd.f32 %v882_v39, %v690_v42 }
 0x2b7   :  { %v1305_v46 = vpop.f32.mrf.mxu0  ;;  %v1310_v36 = vpop.f32.mrf.mxu1  ;;  %v1116_v7 = vld [vmem:[#allocation4 + $0x8] sm:$0xff] }
 0x2b8   :  { %1083 = vst.msk [vmem:[#allocation4 + $0x18] sm:$0xff] %vm36_vm0, %v1075_v40 }
 0x2b9   :  { %v885_v47 = vpop.f32.mrf.mxu1  ;;  %v928_v54 = vpop.f32.mrf.mxu0 }
 0x2ba   :  { %v1076_v56 = vadd.f32 %v928_v54, %v691_v50 }
 0x2bb   :  { %v1311_v48 = vpop.f32.mrf.mxu1  ;;  %v1316_v60 = vpop.f32.mrf.mxu0  ;;  %v1117_v11 = vld [vmem:[#allocation4 + $0x10] sm:$0xff] }
 0x2bc   :  { %1084 = vst.msk [vmem:[#allocation4 + $0x20] sm:$0xff] %vm36_vm0, %v1076_v56 }
 0x2bd   :  { %v931_v63 = vpop.f32.mrf.mxu0  ;;  %v974_v1 = vpop.f32.mrf.mxu1 }
 0x2be   :  { %v1077_v57 = vadd.f32 %v974_v1, %v692_v41 }
 0x2bf   :  { %v1317_v2 = vpop.f32.mrf.mxu0  ;;  %v1322_v49 = vpop.f32.mrf.mxu1  ;;  %v1118_v15 = vld [vmem:[#allocation4 + $0x18] sm:$0xff] }
 0x2c0   :  { %1085 = vst.msk [vmem:[#allocation4 + $0x28] sm:$0xff] %vm36_vm0, %v1077_v57 }
 0x2c1   :  { %v977_v51 = vpop.f32.mrf.mxu1  ;;  %v1020_v9 = vpop.f32.mrf.mxu0 }
 0x2c2   :  { %v1078_v13 = vadd.f32 %v1020_v9, %v693_v3 }
 0x2c3   :  { %v1323_v17 = vpop.f32.mrf.mxu1  ;;  %v1328_v53 = vpop.f32.mrf.mxu0  ;;  %v1119_v21 = vld [vmem:[#allocation4 + $0x20] sm:$0xff] }
 0x2c4   :  { %1086 = vst.msk [vmem:[#allocation4 + $0x30] sm:$0xff] %vm36_vm0, %v1078_v13 }
 0x2c5   :  { %v1023_v23 = vpop.f32.mrf.mxu0  ;;  %v1066_v24 = vpop.f32.mrf.mxu1 }
 0x2c6   :  { %v1079_v55 = vadd.f32 %v1066_v24, %v694_v22 }
 0x2c7   :  { %v1329_v25 = vpop.f32.mrf.mxu0  ;;  %v1334_v26 = vpop.f32.mrf.mxu1  ;;  %v1120_v30 = vld [vmem:[#allocation4 + $0x28] sm:$0xff] }
 0x2c8   :  { %1087 = vst.msk [vmem:[#allocation4 + $0x38] sm:$0xff] %vm36_vm0, %v1079_v55 }
 0x2c9   :  { %v1069_v32 = vpop.f32.mrf.mxu1 }
 0x2cb   :  { %v1335_v59 = vpop.f32.mrf.mxu1  ;;  %v1121_v43 = vld [vmem:[#allocation4 + $0x30] sm:$0xff] }
 0x2cf   :  { %v1122_v39 = vld [vmem:[#allocation4 + $0x38] sm:$0xff] }
 0x309   :  { %v1126_v0 = vpop.permute.xlu1 %1125 }
 0x30a   :  { %v1163_v27 = vmul.f32 %v1126_v0, %v1115_v33 }
 0x30c   :  { %v1171_v38 = vpack.c.bf16 %v1163_v27, %v1163_v27 }
 0x30d   :  { %v1131_v4 = vpop.permute.xlu0 %1130 }
 0x30e   :  { %1180 = vst.msk [vmem:[%s1821_s3] sm:$0xf] %vm1179_vm4, %v1171_v38  ;;  %v1164_v6 = vmul.f32 %v1131_v4, %v1116_v7 }
 0x310   :  { %v1172_v8 = vpack.c.bf16 %v1164_v6, %v1164_v6 }
 0x311   :  { %v1136_v10 = vpop.permute.xlu1 %1135 }
 0x312   :  { %1181 = vst.msk [vmem:[%s1821_s3 + $0x4] sm:$0xf] %vm1179_vm4, %v1172_v8  ;;  %v1165_v12 = vmul.f32 %v1136_v10, %v1117_v11 }
 0x314   :  { %v1173_v14 = vpack.c.bf16 %v1165_v12, %v1165_v12 }
 0x315   :  { %v1141_v16 = vpop.permute.xlu0 %1140 }
 0x316   :  { %1182 = vst.msk [vmem:[%s1821_s3 + $0x8] sm:$0xf] %vm1179_vm4, %v1173_v14  ;;  %v1166_v18 = vmul.f32 %v1141_v16, %v1118_v15 }
 0x318   :  { %v1174_v19 = vpack.c.bf16 %v1166_v18, %v1166_v18 }
 0x319   :  { %v1146_v20 = vpop.permute.xlu1 %1145 }
 0x31a   :  { %1183 = vst.msk [vmem:[%s1821_s3 + $0xc] sm:$0xf] %vm1179_vm4, %v1174_v19  ;;  %v1167_v28 = vmul.f32 %v1146_v20, %v1119_v21 }
 0x31c   :  { %v1175_v29 = vpack.c.bf16 %v1167_v28, %v1167_v28 }
 0x31d   :  { %v1151_v31 = vpop.permute.xlu0 %1150 }
 0x31e   :  { %1184 = vst.msk [vmem:[%s1821_s3 + $0x10] sm:$0xf] %vm1179_vm4, %v1175_v29  ;;  %v1168_v34 = vmul.f32 %v1151_v31, %v1120_v30 }
 0x320   :  { %v1176_v35 = vpack.c.bf16 %v1168_v34, %v1168_v34 }
 0x321   :  { %v1156_v42 = vpop.permute.xlu1 %1155 }
 0x322   :  { %1185 = vst.msk [vmem:[%s1821_s3 + $0x14] sm:$0xf] %vm1179_vm4, %v1176_v35  ;;  %v1169_v44 = vmul.f32 %v1156_v42, %v1121_v43 }
 0x324   :  { %v1177_v45 = vpack.c.bf16 %v1169_v44, %v1169_v44 }
 0x325   :  { %v1161_v40 = vpop.permute.xlu0 %1160 }
 0x326   :  { %1186 = vst.msk [vmem:[%s1821_s3 + $0x18] sm:$0xf] %vm1179_vm4, %v1177_v45  ;;  %v1170_v46 = vmul.f32 %v1161_v40, %v1122_v39 }
 0x328   :  { %v1178_v36 = vpack.c.bf16 %v1170_v46, %v1170_v46 }
 0x32a   :  { %1187 = vst.msk [vmem:[%s1821_s3 + $0x1c] sm:$0xf] %vm1179_vm4, %v1178_v36 }

</bundles_post_ra>
